<compile_context>
chip_gen: v5e
topology: v5e:2x2
jax: 0.10.0
libtpu: 0.0.40
codegen_flags: <defaults>
</compile_context>

<pallas_src>
import functools

import jax
import jax.numpy as jnp
from jax.experimental import pallas as pl
from jax.experimental.pallas import tpu as pltpu


def _diffusion_dense_kernel(x_ref, w1_ref, b1_ref, w2_ref, b2_ref, o_ref, *, bf16_tanh):
    # fc1: (tm, D_in) @ (D_in, H) -- bf16 operands on the MXU, f32 accumulation.
    h = jnp.dot(x_ref[...], w1_ref[...], preferred_element_type=jnp.float32)
    h = h + b1_ref[...]                               # f32 bias add (VPU)
    if bf16_tanh:
        # v6e/v7x: EUP bf16 tanh (the value is truncated to bf16 for fc2 anyway).
        h = jnp.tanh(h.astype(jnp.bfloat16))
    else:
        h = jnp.tanh(h).astype(jnp.bfloat16)          # f32 tanh (v5e EUP has no bf16)
    # fc2: (tm, H) @ (H, D_out)
    y = jnp.dot(h, w2_ref[...], preferred_element_type=jnp.float32)
    o_ref[...] = jnp.tanh(y + b2_ref[...]).astype(o_ref.dtype)


def _default_tile_config():
    """(row_tile, use_bf16_tanh) chosen from the attached TPU generation."""
    try:
        kind = jax.devices()[0].device_kind.lower()
    except Exception:
        kind = ""
    if "v6" in kind or "v7" in kind:
        return 256, True       # 2x256^2 MXU; EUP supports bf16
    return 128, False          # v5e & older: 128x128 MXU passes; f32 tanh only


@functools.partial(
    jax.jit, static_argnames=("row_tile", "use_bf16_tanh", "single_buffer_weights"))
def _diffusion_dense_impl(x, w1_t, b1, w2_t, b2, *, row_tile, use_bf16_tanh,
                          single_buffer_weights):
    B, D_in = x.shape
    H = w1_t.shape[1]
    D_out = w2_t.shape[1]

    # Stream x as bf16: halves per-row HBM bytes once the weights are resident and
    # removes the full-tile VPU cast from the kernel body.
    if x.dtype != jnp.bfloat16:
        x = x.astype(jnp.bfloat16)

    # Row tile: a batch that already fits one block is NEVER split (single grid step);
    # otherwise use the device-tuned tile rounded down to a multiple of 8 sublanes.
    if B <= row_tile:
        tm = B
    else:
        tm = max(8, (row_tile // 8) * 8)
    num_tiles = pl.cdiv(B, tm)        # partial edge block handled by Pallas (masked)

    # Megacore sharding only pays off with many tiles; with <= 2 tiles each core would
    # re-DMA the full resident weights, doubling the dominant bytes at small batch.
    dim_sem = ("arbitrary",) if num_tiles <= 2 else ("parallel",)

    # Constant-index operands are DMA'd once and never change block: single-buffer them.
    const_kw = {}
    if single_buffer_weights and hasattr(pl, "Buffered"):
        const_kw = dict(pipeline_mode=pl.Buffered(1))

    in_specs = [
        pl.BlockSpec((tm, D_in), lambda i: (i, 0)),              # x: new row tile / step
        pl.BlockSpec((D_in, H), lambda i: (0, 0), **const_kw),   # w1: VMEM resident
        pl.BlockSpec((1, H), lambda i: (0, 0), **const_kw),      # b1: resident
        pl.BlockSpec((H, D_out), lambda i: (0, 0), **const_kw),  # w2: resident
        pl.BlockSpec((1, D_out), lambda i: (0, 0), **const_kw),  # b2: resident
    ]

    # VMEM budget derived from the actual footprint (+2 MiB headroom), scales with tm.
    weight_bufs = 1 if single_buffer_weights else 2
    resident = weight_bufs * (D_in * H * 2 + H * D_out * 2 + 8 * H * 4 + 8 * D_out * 4)
    streamed = 2 * (tm * D_in * 2) + 2 * (tm * D_out * 4)   # double-buffered x / out
    scratch = tm * H * 4 + tm * H * 2 + tm * D_out * 4      # h(f32), h(bf16), y(f32)
    vmem_limit = min(max(resident + streamed + 2 * scratch + (2 << 20), 4 << 20), 32 << 20)

    cost = pl.CostEstimate(
        flops=2 * B * (D_in * H + H * D_out),
        transcendentals=B * (H + D_out),
        bytes_accessed=(x.size * 2 + w1_t.size * 2 + w2_t.size * 2
                        + b1.size * 4 + b2.size * 4 + B * D_out * 4),
    )

    kernel = functools.partial(_diffusion_dense_kernel, bf16_tanh=use_bf16_tanh)
    return pl.pallas_call(
        kernel,
        out_shape=jax.ShapeDtypeStruct((B, D_out), jnp.float32),
        grid=(num_tiles,),
        in_specs=in_specs,
        out_specs=pl.BlockSpec((tm, D_out), lambda i: (i, 0)),
        compiler_params=pltpu.CompilerParams(
            dimension_semantics=dim_sem,
            vmem_limit_bytes=int(vmem_limit),
        ),
        cost_estimate=cost,
    )(x, w1_t, b1, w2_t, b2)


def diffusion_dense(x, w1_t, b1, w2_t, b2, *, row_tile=None, use_bf16_tanh=None,
                    single_buffer_weights=True):
    """x: (B, D_in); w1_t: (D_in, 512) bf16; b1: (1, 512) f32;
       w2_t: (512, D_out) bf16; b2: (1, D_out) f32. Returns (B, D_out) f32."""
    rt, bt = _default_tile_config()
    if row_tile is None:
        row_tile = rt
    if use_bf16_tanh is None:
        use_bf16_tanh = bt
    try:
        return _diffusion_dense_impl(
            x, w1_t, b1, w2_t, b2, row_tile=row_tile, use_bf16_tanh=use_bf16_tanh,
            single_buffer_weights=single_buffer_weights)
    except Exception:
        if not single_buffer_weights:
            raise
        # Fallback if this jax/Mosaic build rejects pl.Buffered(1) on resident operands.
        return _diffusion_dense_impl(
            x, w1_t, b1, w2_t, b2, row_tile=row_tile, use_bf16_tanh=use_bf16_tanh,
            single_buffer_weights=False)


if __name__ == "__main__":
    # Shapes consistent with the module: flattened_img_size=256, flattened_out_size=128,
    # hidden=512 (fixed by the module), batch=16 -> a single grid step (tm = 16).
    B = 16
    FLATTENED_IMG_SIZE = 256
    FLATTENED_OUT_SIZE = 128
    HIDDEN = 512

    key = jax.random.PRNGKey(0)
    kx, kw1, kb1, kw2, kb2 = jax.random.split(key, 5)

    x = jax.random.normal(kx, (B, FLATTENED_IMG_SIZE), dtype=jnp.float32)

    # PyTorch Linear stores W as (out, in); transpose to (in, out) for the kernel.
    w1 = jax.random.normal(kw1, (HIDDEN, FLATTENED_IMG_SIZE), dtype=jnp.float32) * 0.02
    b1 = jax.random.normal(kb1, (HIDDEN,), dtype=jnp.float32) * 0.02
    w2 = jax.random.normal(kw2, (FLATTENED_OUT_SIZE, HIDDEN), dtype=jnp.float32) * 0.02
    b2 = jax.random.normal(kb2, (FLATTENED_OUT_SIZE,), dtype=jnp.float32) * 0.02

    w1_t = jnp.transpose(w1).astype(jnp.bfloat16)     # (D_in, 512) bf16
    w2_t = jnp.transpose(w2).astype(jnp.bfloat16)     # (512, D_out) bf16
    b1_2d = b1.reshape(1, HIDDEN)
    b2_2d = b2.reshape(1, FLATTENED_OUT_SIZE)

    out = diffusion_dense(x, w1_t, b1_2d, w2_t, b2_2d)
    out = jax.block_until_ready(out)
    assert out.shape == (B, FLATTENED_OUT_SIZE)
    assert out.dtype == jnp.float32

    # Reference matching the kernel's reduced-precision semantics
    # (bf16 x/weights, f32 accumulation, optional bf16 first tanh).
    _, bf16_tanh_cfg = _default_tile_config()
    f32 = jnp.float32
    xb = x.astype(jnp.bfloat16).astype(f32)
    w1b = w1.astype(jnp.bfloat16).astype(f32)
    w2b = w2.astype(jnp.bfloat16).astype(f32)
    h_ref = xb @ w1b.T + b1
    if bf16_tanh_cfg:
        h_ref = h_ref.astype(jnp.bfloat16).astype(f32)
    h_ref = jnp.tanh(h_ref).astype(jnp.bfloat16).astype(f32)
    ref_match = jnp.tanh(h_ref @ w2b.T + b2)
    assert jnp.allclose(out, ref_match, atol=1e-2, rtol=1e-2)

    # Full-precision PyTorch-equivalent reference (loose tolerance for the bf16 path).
    ref_f32 = jnp.tanh(jnp.tanh(x @ w1.T + b1) @ w2.T + b2)
    assert jnp.allclose(out, ref_f32, atol=3e-2, rtol=3e-2)

    print("KERNEL_OK")
</pallas_src>

<mosaic_0001>
module attributes {stable_mosaic.version = 11 : i64} {
  func.func @_diffusion_dense_kernel(%arg0: i32, %arg1: memref<16x256xbf16, #tpu.memory_space<vmem>>, %arg2: memref<256x512xbf16, #tpu.memory_space<vmem>>, %arg3: memref<1x512xf32, #tpu.memory_space<vmem>>, %arg4: memref<512x128xbf16, #tpu.memory_space<vmem>>, %arg5: memref<1x128xf32, #tpu.memory_space<vmem>>, %arg6: memref<16x128xf32, #tpu.memory_space<vmem>>) attributes {dimension_semantics = [#tpu.dimension_semantics<arbitrary>], iteration_bounds = array<i64: 1>, scalar_prefetch = 0 : i64, scratch_operands = 0 : i64, tpu.core_type = #tpu.core_type<tc>, window_params = [{transform_indices = @transform_0, window_bounds = array<i64: 16, 256>}, {pipeline_mode = #tpu.pipeline_mode<synchronous>, transform_indices = @transform_1, window_bounds = array<i64: 256, 512>}, {pipeline_mode = #tpu.pipeline_mode<synchronous>, transform_indices = @transform_2, window_bounds = array<i64: 1, 512>}, {pipeline_mode = #tpu.pipeline_mode<synchronous>, transform_indices = @transform_3, window_bounds = array<i64: 512, 128>}, {pipeline_mode = #tpu.pipeline_mode<synchronous>, transform_indices = @transform_4, window_bounds = array<i64: 1, 128>}, {transform_indices = @transform_5, window_bounds = array<i64: 16, 128>}]} {
    %c0 = arith.constant 0 : index
    %c0_0 = arith.constant 0 : index
    %0 = vector.load %arg1[%c0, %c0_0] : memref<16x256xbf16, #tpu.memory_space<vmem>>, vector<16x256xbf16>
    %c0_1 = arith.constant 0 : index
    %c0_2 = arith.constant 0 : index
    %1 = vector.load %arg2[%c0_1, %c0_2] : memref<256x512xbf16, #tpu.memory_space<vmem>>, vector<256x512xbf16>
    %cst = arith.constant dense<0.000000e+00> : vector<16x512xf32>
    %2 = tpu.matmul %0, %1, %cst {dimension_numbers = #tpu.dot_dimension_numbers<[1], [0], [0], [1], [0, 0, 1, 1], [], []>} : vector<16x256xbf16>, vector<256x512xbf16>, vector<16x512xf32> -> vector<16x512xf32>
    %c0_3 = arith.constant 0 : index
    %c0_4 = arith.constant 0 : index
    %3 = vector.load %arg3[%c0_3, %c0_4] : memref<1x512xf32, #tpu.memory_space<vmem>>, vector<1x512xf32>
    %4 = vector.broadcast %3 : vector<1x512xf32> to vector<16x512xf32>
    %5 = arith.addf %2, %4 : vector<16x512xf32>
    %6 = math.tanh %5 : vector<16x512xf32>
    %7 = arith.truncf %6 : vector<16x512xf32> to vector<16x512xbf16>
    %c0_5 = arith.constant 0 : index
    %c0_6 = arith.constant 0 : index
    %8 = vector.load %arg4[%c0_5, %c0_6] : memref<512x128xbf16, #tpu.memory_space<vmem>>, vector<512x128xbf16>
    %cst_7 = arith.constant dense<0.000000e+00> : vector<16x128xf32>
    %9 = tpu.matmul %7, %8, %cst_7 {dimension_numbers = #tpu.dot_dimension_numbers<[1], [0], [0], [1], [0, 0, 1, 1], [], []>} : vector<16x512xbf16>, vector<512x128xbf16>, vector<16x128xf32> -> vector<16x128xf32>
    %c0_8 = arith.constant 0 : index
    %c0_9 = arith.constant 0 : index
    %10 = vector.load %arg5[%c0_8, %c0_9] : memref<1x128xf32, #tpu.memory_space<vmem>>, vector<1x128xf32>
    %11 = vector.broadcast %10 : vector<1x128xf32> to vector<16x128xf32>
    %12 = arith.addf %9, %11 : vector<16x128xf32>
    %13 = math.tanh %12 : vector<16x128xf32>
    %c0_10 = arith.constant 0 : index
    %c0_11 = arith.constant 0 : index
    %14 = vector.load %arg6[%c0_10, %c0_11] : memref<16x128xf32, #tpu.memory_space<vmem>>, vector<16x128xf32>
    tpu.vector_store %arg6[%c0_10, %c0_11], %13 {strides = array<i32>} : memref<16x128xf32, #tpu.memory_space<vmem>>, vector<16x128xf32>,
    return
  }
  func.func @transform_0(%arg0: i32) -> (i32, i32) {
    %c0_i32 = arith.constant 0 : i32
    %c0_i32_0 = arith.constant 0 : i32
    return %arg0, %c0_i32 : i32, i32
  }
  func.func @transform_1(%arg0: i32) -> (i32, i32) {
    %c0_i32 = arith.constant 0 : i32
    %c0_i32_0 = arith.constant 0 : i32
    %c0_i32_1 = arith.constant 0 : i32
    return %c0_i32, %c0_i32_0 : i32, i32
  }
  func.func @transform_2(%arg0: i32) -> (i32, i32) {
    %c0_i32 = arith.constant 0 : i32
    %c0_i32_0 = arith.constant 0 : i32
    %c0_i32_1 = arith.constant 0 : i32
    return %c0_i32, %c0_i32_0 : i32, i32
  }
  func.func @transform_3(%arg0: i32) -> (i32, i32) {
    %c0_i32 = arith.constant 0 : i32
    %c0_i32_0 = arith.constant 0 : i32
    %c0_i32_1 = arith.constant 0 : i32
    return %c0_i32, %c0_i32_0 : i32, i32
  }
  func.func @transform_4(%arg0: i32) -> (i32, i32) {
    %c0_i32 = arith.constant 0 : i32
    %c0_i32_0 = arith.constant 0 : i32
    %c0_i32_1 = arith.constant 0 : i32
    return %c0_i32, %c0_i32_0 : i32, i32
  }
  func.func @transform_5(%arg0: i32) -> (i32, i32) {
    %c0_i32 = arith.constant 0 : i32
    %c0_i32_0 = arith.constant 0 : i32
    return %arg0, %c0_i32 : i32, i32
  }
}

module attributes {stable_mosaic.version = 11 : i64} {
  func.func @_diffusion_dense_kernel(%arg0: i32, %arg1: memref<16x256xbf16, #tpu.memory_space<vmem>>, %arg2: memref<256x512xbf16, #tpu.memory_space<vmem>>, %arg3: memref<1x512xf32, #tpu.memory_space<vmem>>, %arg4: memref<512x128xbf16, #tpu.memory_space<vmem>>, %arg5: memref<1x128xf32, #tpu.memory_space<vmem>>, %arg6: memref<16x128xf32, #tpu.memory_space<vmem>>) attributes {dimension_semantics = [#tpu.dimension_semantics<arbitrary>], iteration_bounds = array<i64: 1>, scalar_prefetch = 0 : i64, scratch_operands = 0 : i64, tpu.core_type = #tpu.core_type<tc>, window_params = [{transform_indices = @transform_0, window_bounds = array<i64: 16, 256>}, {pipeline_mode = #tpu.pipeline_mode<synchronous>, transform_indices = @transform_1, window_bounds = array<i64: 256, 512>}, {pipeline_mode = #tpu.pipeline_mode<synchronous>, transform_indices = @transform_2, window_bounds = array<i64: 1, 512>}, {pipeline_mode = #tpu.pipeline_mode<synchronous>, transform_indices = @transform_3, window_bounds = array<i64: 512, 128>}, {pipeline_mode = #tpu.pipeline_mode<synchronous>, transform_indices = @transform_4, window_bounds = array<i64: 1, 128>}, {transform_indices = @transform_5, window_bounds = array<i64: 16, 128>}]} {
    %c0 = arith.constant 0 : index
    %c0_0 = arith.constant 0 : index
    %0 = vector.load %arg1[%c0, %c0_0] : memref<16x256xbf16, #tpu.memory_space<vmem>>, vector<16x256xbf16>
    %c0_1 = arith.constant 0 : index
    %c0_2 = arith.constant 0 : index
    %1 = vector.load %arg2[%c0_1, %c0_2] : memref<256x512xbf16, #tpu.memory_space<vmem>>, vector<256x512xbf16>
    %cst = arith.constant dense<0.000000e+00> : vector<16x512xf32>
    %2 = tpu.matmul %0, %1, %cst {dimension_numbers = #tpu.dot_dimension_numbers<[1], [0], [0], [1], [0, 0, 1, 1], [], []>} : vector<16x256xbf16>, vector<256x512xbf16>, vector<16x512xf32> -> vector<16x512xf32>
    %c0_3 = arith.constant 0 : index
    %c0_4 = arith.constant 0 : index
    %3 = vector.load %arg3[%c0_3, %c0_4] : memref<1x512xf32, #tpu.memory_space<vmem>>, vector<1x512xf32>
    %4 = vector.broadcast %3 : vector<1x512xf32> to vector<16x512xf32>
    %5 = arith.addf %2, %4 : vector<16x512xf32>
    %6 = math.tanh %5 : vector<16x512xf32>
    %7 = arith.truncf %6 : vector<16x512xf32> to vector<16x512xbf16>
    %c0_5 = arith.constant 0 : index
    %c0_6 = arith.constant 0 : index
    %8 = vector.load %arg4[%c0_5, %c0_6] : memref<512x128xbf16, #tpu.memory_space<vmem>>, vector<512x128xbf16>
    %cst_7 = arith.constant dense<0.000000e+00> : vector<16x128xf32>
    %9 = tpu.matmul %7, %8, %cst_7 {dimension_numbers = #tpu.dot_dimension_numbers<[1], [0], [0], [1], [0, 0, 1, 1], [], []>} : vector<16x512xbf16>, vector<512x128xbf16>, vector<16x128xf32> -> vector<16x128xf32>
    %c0_8 = arith.constant 0 : index
    %c0_9 = arith.constant 0 : index
    %10 = vector.load %arg5[%c0_8, %c0_9] : memref<1x128xf32, #tpu.memory_space<vmem>>, vector<1x128xf32>
    %11 = vector.broadcast %10 : vector<1x128xf32> to vector<16x128xf32>
    %12 = arith.addf %9, %11 : vector<16x128xf32>
    %13 = math.tanh %12 : vector<16x128xf32>
    %c0_10 = arith.constant 0 : index
    %c0_11 = arith.constant 0 : index
    %14 = vector.load %arg6[%c0_10, %c0_11] : memref<16x128xf32, #tpu.memory_space<vmem>>, vector<16x128xf32>
    tpu.vector_store %arg6[%c0_10, %c0_11], %13 {strides = array<i32>} : memref<16x128xf32, #tpu.memory_space<vmem>>, vector<16x128xf32>,
    return
  }
  func.func @transform_0(%arg0: i32) -> (i32, i32) {
    %c0_i32 = arith.constant 0 : i32
    %c0_i32_0 = arith.constant 0 : i32
    return %arg0, %c0_i32 : i32, i32
  }
  func.func @transform_1(%arg0: i32) -> (i32, i32) {
    %c0_i32 = arith.constant 0 : i32
    %c0_i32_0 = arith.constant 0 : i32
    %c0_i32_1 = arith.constant 0 : i32
    return %c0_i32, %c0_i32_0 : i32, i32
  }
  func.func @transform_2(%arg0: i32) -> (i32, i32) {
    %c0_i32 = arith.constant 0 : i32
    %c0_i32_0 = arith.constant 0 : i32
    %c0_i32_1 = arith.constant 0 : i32
    return %c0_i32, %c0_i32_0 : i32, i32
  }
  func.func @transform_3(%arg0: i32) -> (i32, i32) {
    %c0_i32 = arith.constant 0 : i32
    %c0_i32_0 = arith.constant 0 : i32
    %c0_i32_1 = arith.constant 0 : i32
    return %c0_i32, %c0_i32_0 : i32, i32
  }
  func.func @transform_4(%arg0: i32) -> (i32, i32) {
    %c0_i32 = arith.constant 0 : i32
    %c0_i32_0 = arith.constant 0 : i32
    %c0_i32_1 = arith.constant 0 : i32
    return %c0_i32, %c0_i32_0 : i32, i32
  }
  func.func @transform_5(%arg0: i32) -> (i32, i32) {
    %c0_i32 = arith.constant 0 : i32
    %c0_i32_0 = arith.constant 0 : i32
    return %arg0, %c0_i32 : i32, i32
  }
}

</mosaic_0001>

<bundles_post_ra>
// kernel: _diffusion_dense_impl.1
= control target key start
LH: loop header
LB: loop body
LE: loop exit
PB: predicated region body
PF: predicated region fallthrough
CT: control target
= control target key end

     0   :  { %10 = vsyncpa [#allocation3], 0  ;;  %s1605_s0 = inlined_call_operand.vmem [shape: bf16[16,256], index: 0, kind: input, shape index: {}]   ;;  %s1606_s1 = inlined_call_operand.hbm [shape: bf16[256,512], index: 1, kind: input, shape index: {}]   ;;  %s1607_s2 = inlined_call_operand.vmem [shape: f32[1,512], index: 2, kind: input, shape index: {}]   ;;  %s1608_s3 = inlined_call_operand.hbm [shape: bf16[512,128], index: 3, kind: input, shape index: {}]   ;;  %s1609_s4 = inlined_call_operand.vmem [shape: f32[1,128], index: 4, kind: input, shape index: {}]   ;;  %s1610_s5 = inlined_call_operand.hbm [shape: f32[16,128], index: 5, kind: output, shape index: {}]  }
   0x1   :  { %11 = vsyncpa [#allocation6], 0 }
   0x2   :  { %12 = vsyncpa [#allocation4], 0  ;;  %s19_s20 = sshll.u32 %s1606_s1, 4  ;;  %s1521_s21 = smov [#allocation2]   ;;  %s20_s20 = int_to_ptr.hbm [resolvable:$true] %s19_s20 }
   0x3   :  { %s21_s22 = sshll.u32 %s1521_s21, 4  ;;  %s34_s25 = sshll.u32 %s1608_s3, 4  ;;  %s22_s22 = int_to_ptr.vmem [resolvable:$true] %s21_s22  ;;  %s35_s25 = int_to_ptr.hbm [resolvable:$true] %s34_s25 }
   0x4   :  { %s1522_s26 = smov 256   ;;  %s1523_s27 = smov 16  }
   0x5   :  { %27 = dma.hbm_to_vmem [thread:$0]  %s20_s20, 8192, %s22_s22, [#allocation3], %s1522_s26, %s1522_s26, %s1523_s27  }
   0x6   :  { %s1524_s28 = smov [#allocation5]   ;;  %s1525_s30 = smov 64  }
   0x7   :  { %s36_s29 = sshll.u32 %s1524_s28, 4  ;;  %s1526_s6 = smov 4   ;;  %s37_s29 = int_to_ptr.vmem [resolvable:$true] %s36_s29 }
   0x8   :  { %42 = dma.hbm_to_vmem [thread:$0]  %s35_s25, 4096, %s37_s29, [#allocation6], %s1525_s30, %s1525_s30, %s1526_s6  }
   0x9   :  { %1515 = dma.done.wait [#allocation3], 8192  }
   0xa   :  { %1516 = vsyncadd [#allocation3], 4294959104 }
   0xb   :  { %1517 = dma.done.wait [#allocation6], 4096  }
   0xc   :  { %1518 = vsyncadd [#allocation6], 4294963200  ;;  %v1045_v0 = vld [vmem:[#allocation2 + $0xe0] sm:$0xf]  ;;  %v1347_v1 = vld [vmem:[#allocation2 + $0xec] sm:$0xf0] }
   0xd   :  { %v1173_v2 = vld [vmem:[#allocation2 + $0x1e0] sm:$0xf]  ;;  %v1046_v3 = vor.u32 %v1347_v1, %v1045_v0  ;;  %v1379_v4 = vld [vmem:[#allocation2 + $0x1ec] sm:$0xf0]  ;;  %v1345_v5 = vld [vmem:[#allocation2 + $0xe4] sm:$0xf] }
   0xe   :  { %v1047_v6 = vld [vmem:[#allocation2 + $0xf0] sm:$0xf0]  ;;  %v1174_v7 = vor.u32 %v1379_v4, %v1173_v2  ;;  %v1377_v9 = vld [vmem:[#allocation2 + $0x1e4] sm:$0xf]  ;;  %v1029_v11 = vld [vmem:[#allocation2 + $0xc0] sm:$0xf] }
   0xf   :  { %v1050_v8 = vor.u32 %v1345_v5, %v1047_v6  ;;  %v1175_v10 = vld [vmem:[#allocation2 + $0x1f0] sm:$0xf0]  ;;  %459 = vmatpush.bf16.msra.mxu0 %v1046_v3  ;;  %v1343_v13 = vld [vmem:[#allocation2 + $0xcc] sm:$0xf0]  ;;  %v1157_v14 = vld [vmem:[#allocation2 + $0x1c0] sm:$0xf] }
  0x10   :  { %v1178_v12 = vor.u32 %v1377_v9, %v1175_v10  ;;  %v1375_v15 = vld [vmem:[#allocation2 + $0x1cc] sm:$0xf0]  ;;  %473 = vmatpush.bf16.msra.mxu1 %v1174_v7  ;;  %v1030_v16 = vor.u32 %v1343_v13, %v1029_v11  ;;  %v1341_v18 = vld [vmem:[#allocation2 + $0xc4] sm:$0xf]  ;;  %v1031_v19 = vld [vmem:[#allocation2 + $0xd0] sm:$0xf0] }
  0x11   :  { %487 = vmatpush.bf16.msra.mxu2 %v1050_v8  ;;  %v1158_v17 = vor.u32 %v1375_v15, %v1157_v14  ;;  %v1373_v20 = vld [vmem:[#allocation2 + $0x1c4] sm:$0xf]  ;;  %v1034_v21 = vor.u32 %v1341_v18, %v1031_v19  ;;  %v1159_v22 = vld [vmem:[#allocation2 + $0x1d0] sm:$0xf0]  ;;  %v1013_v23 = vld [vmem:[#allocation2 + $0xa0] sm:$0xf] }
  0x12   :  { %501 = vmatpush.bf16.msra.mxu3 %v1178_v12  ;;  %v1339_v24 = vld [vmem:[#allocation2 + $0xac] sm:$0xf0]  ;;  %v1162_v25 = vor.u32 %v1373_v20, %v1159_v22  ;;  %v1141_v26 = vld [vmem:[#allocation2 + $0x1a0] sm:$0xf]  ;;  %v1337_v28 = vld [vmem:[#allocation2 + $0xa4] sm:$0xf] }
  0x13   :  { %v1371_v27 = vld [vmem:[#allocation2 + $0x1ac] sm:$0xf0]  ;;  %460 = vmatpush.bf16.msra.mxu0 %v1030_v16  ;;  %v1014_v29 = vor.u32 %v1339_v24, %v1013_v23  ;;  %v1015_v30 = vld [vmem:[#allocation2 + $0xb0] sm:$0xf0]  ;;  %v1369_v31 = vld [vmem:[#allocation2 + $0x1a4] sm:$0xf] }
  0x14   :  { %v1143_v32 = vld [vmem:[#allocation2 + $0x1b0] sm:$0xf0]  ;;  %474 = vmatpush.bf16.msra.mxu1 %v1158_v17  ;;  %v1142_v33 = vor.u32 %v1371_v27, %v1141_v26  ;;  %v1018_v34 = vor.u32 %v1337_v28, %v1015_v30  ;;  %v997_v35 = vld [vmem:[#allocation2 + $0x80] sm:$0xf]  ;;  %v1335_v36 = vld [vmem:[#allocation2 + $0x8c] sm:$0xf0] }
  0x15   :  { %488 = vmatpush.bf16.msra.mxu2 %v1034_v21  ;;  %v1125_v37 = vld [vmem:[#allocation2 + $0x180] sm:$0xf]  ;;  %v1146_v38 = vor.u32 %v1369_v31, %v1143_v32  ;;  %v1367_v39 = vld [vmem:[#allocation2 + $0x18c] sm:$0xf0]  ;;  %v1333_v40 = vld [vmem:[#allocation2 + $0x84] sm:$0xf]  ;;  %v998_v44 = vor.u32 %v1335_v36, %v997_v35 }
  0x16   :  { %502 = vmatpush.bf16.msra.mxu3 %v1162_v25  ;;  %v999_v41 = vld [vmem:[#allocation2 + $0x90] sm:$0xf0]  ;;  %v1365_v42 = vld [vmem:[#allocation2 + $0x184] sm:$0xf]  ;;  %v1126_v45 = vor.u32 %v1367_v39, %v1125_v37  ;;  %v981_v47 = vld [vmem:[#allocation2 + $0x60] sm:$0xf] }
  0x17   :  { %v1127_v43 = vld [vmem:[#allocation2 + $0x190] sm:$0xf0]  ;;  %461 = vmatpush.bf16.msra.mxu0 %v1014_v29  ;;  %v1002_v46 = vor.u32 %v1333_v40, %v999_v41  ;;  %v1331_v48 = vld [vmem:[#allocation2 + $0x6c] sm:$0xf0]  ;;  %v1109_v49 = vld [vmem:[#allocation2 + $0x160] sm:$0xf] }
  0x18   :  { %475 = vmatpush.bf16.msra.mxu1 %v1142_v33  ;;  %v1130_v50 = vor.u32 %v1365_v42, %v1127_v43  ;;  %v1363_v51 = vld [vmem:[#allocation2 + $0x16c] sm:$0xf0]  ;;  %v1329_v52 = vld [vmem:[#allocation2 + $0x64] sm:$0xf]  ;;  %v983_v53 = vld [vmem:[#allocation2 + $0x70] sm:$0xf0]  ;;  %v982_v56 = vor.u32 %v1331_v48, %v981_v47 }
  0x19   :  { %489 = vmatpush.bf16.msra.mxu2 %v1018_v34  ;;  %v1361_v54 = vld [vmem:[#allocation2 + $0x164] sm:$0xf]  ;;  %v1111_v55 = vld [vmem:[#allocation2 + $0x170] sm:$0xf0]  ;;  %v1110_v57 = vor.u32 %v1363_v51, %v1109_v49  ;;  %v986_v58 = vor.u32 %v1329_v52, %v983_v53  ;;  %v965_v59 = vld [vmem:[#allocation2 + $0x40] sm:$0xf] }
  0x1a   :  { %503 = vmatpush.bf16.msra.mxu3 %v1146_v38  ;;  %v1327_v60 = vld [vmem:[#allocation2 + $0x4c] sm:$0xf0]  ;;  %v1093_v61 = vld [vmem:[#allocation2 + $0x140] sm:$0xf]  ;;  %v1114_v62 = vor.u32 %v1361_v54, %v1111_v55  ;;  %v1325_v0 = vld [vmem:[#allocation2 + $0x44] sm:$0xf] }
  0x1b   :  { %462 = vmatpush.bf16.msra.mxu0 %v998_v44  ;;  %v1359_v63 = vld [vmem:[#allocation2 + $0x14c] sm:$0xf0]  ;;  %v967_v1 = vld [vmem:[#allocation2 + $0x50] sm:$0xf0]  ;;  %v1357_v2 = vld [vmem:[#allocation2 + $0x144] sm:$0xf]  ;;  %v966_v4 = vor.u32 %v1327_v60, %v965_v59 }
  0x1c   :  { %476 = vmatpush.bf16.msra.mxu1 %v1126_v45  ;;  %v1095_v3 = vld [vmem:[#allocation2 + $0x150] sm:$0xf0]  ;;  %v1094_v5 = vor.u32 %v1359_v63, %v1093_v61  ;;  %v970_v6 = vor.u32 %v1325_v0, %v967_v1  ;;  %v949_v7 = vld [vmem:[#allocation2 + $0x20] sm:$0xf]  ;;  %v1323_v8 = vld [vmem:[#allocation2 + $0x2c] sm:$0xf0] }
  0x1d   :  { %490 = vmatpush.bf16.msra.mxu2 %v1002_v46  ;;  %v1077_v9 = vld [vmem:[#allocation2 + $0x120] sm:$0xf]  ;;  %v1098_v10 = vor.u32 %v1357_v2, %v1095_v3  ;;  %v1355_v11 = vld [vmem:[#allocation2 + $0x12c] sm:$0xf0]  ;;  %v1321_v12 = vld [vmem:[#allocation2 + $0x24] sm:$0xf]  ;;  %v950_v16 = vor.u32 %v1323_v8, %v949_v7 }
  0x1e   :  { %504 = vmatpush.bf16.msra.mxu3 %v1130_v50  ;;  %v951_v13 = vld [vmem:[#allocation2 + $0x30] sm:$0xf0]  ;;  %v1353_v14 = vld [vmem:[#allocation2 + $0x124] sm:$0xf]  ;;  %v933_v17 = vld [vmem:[#allocation2] sm:$0xf]  ;;  %v1078_v20 = vor.u32 %v1355_v11, %v1077_v9 }
  0x1f   :  { %463 = vmatpush.bf16.msra.mxu0 %v982_v56  ;;  %v1079_v15 = vld [vmem:[#allocation2 + $0x130] sm:$0xf0]  ;;  %v1319_v18 = vld [vmem:[#allocation2 + $0xc] sm:$0xf0]  ;;  %v1061_v19 = vld [vmem:[#allocation2 + $0x100] sm:$0xf]  ;;  %v954_v21 = vor.u32 %v1321_v12, %v951_v13 }
  0x20   :  { %477 = vmatpush.bf16.msra.mxu1 %v1110_v57  ;;  %v1351_v22 = vld [vmem:[#allocation2 + $0x10c] sm:$0xf0]  ;;  %v1317_v23 = vld [vmem:[#allocation2 + $0x4] sm:$0xf]  ;;  %v935_v24 = vld [vmem:[#allocation2 + $0x10] sm:$0xf0]  ;;  %v1082_v25 = vor.u32 %v1353_v14, %v1079_v15  ;;  %v934_v32 = vor.u32 %v1319_v18, %v933_v17 }
  0x21   :  { %491 = vmatpush.bf16.msra.mxu2 %v986_v58  ;;  %v1349_v26 = vld [vmem:[#allocation2 + $0x104] sm:$0xf]  ;;  %v1063_v27 = vld [vmem:[#allocation2 + $0x110] sm:$0xf0]  ;;  %v1053_v28 = vld [vmem:[#allocation2 + $0xe8] sm:$0xf]  ;;  %v1062_v36 = vor.u32 %v1351_v22, %v1061_v19  ;;  %v938_v37 = vor.u32 %v1317_v23, %v935_v24 }
  0x22   :  { %505 = vmatpush.bf16.msra.mxu3 %v1114_v62  ;;  %v1348_v29 = vld [vmem:[#allocation2 + $0xf4] sm:$0xf0]  ;;  %v1181_v30 = vld [vmem:[#allocation2 + $0x1e8] sm:$0xf]  ;;  %v1346_v33 = vld [vmem:[#allocation2 + $0xec] sm:$0xf]  ;;  %v1066_v41 = vor.u32 %v1349_v26, %v1063_v27 }
  0x23   :  { %464 = vmatpush.bf16.msra.mxu0 %v966_v4  ;;  %v1380_v31 = vld [vmem:[#allocation2 + $0x1f4] sm:$0xf0]  ;;  %v1055_v34 = vld [vmem:[#allocation2 + $0xf8] sm:$0xf0]  ;;  %v1378_v35 = vld [vmem:[#allocation2 + $0x1ec] sm:$0xf]  ;;  %v1054_v42 = vor.u32 %v1348_v29, %v1053_v28 }
  0x24   :  { %478 = vmatpush.bf16.msra.mxu1 %v1094_v5  ;;  %v1183_v38 = vld [vmem:[#allocation2 + $0x1f8] sm:$0xf0]  ;;  %v925_v39 = vld [vmem:[%s1605_s0] sm:$0xf]  ;;  %v1316_v40 = vld [vmem:[%s1605_s0 + $0x4] sm:$0xf0]  ;;  %v1182_v45 = vor.u32 %v1380_v31, %v1181_v30  ;;  %v1058_v46 = vor.u32 %v1346_v33, %v1055_v34 }
  0x25   :  { %492 = vmatpush.bf16.msra.mxu2 %v970_v6  ;;  %v1315_v43 = vld [vmem:[%s1605_s0 + $0x4] sm:$0xf]  ;;  %v927_v44 = vld [vmem:[%s1605_s0 + $0x8] sm:$0xf0]  ;;  %v1037_v47 = vld [vmem:[#allocation2 + $0xc8] sm:$0xf]  ;;  %v1186_v50 = vor.u32 %v1378_v35, %v1183_v38  ;;  %v1578_v51 = vor.u32 %v1316_v40, %v925_v39 }
  0x26   :  { %506 = vmatpush.bf16.msra.mxu3 %v1098_v10  ;;  %v1344_v48 = vld [vmem:[#allocation2 + $0xd4] sm:$0xf0]  ;;  %v1165_v49 = vld [vmem:[#allocation2 + $0x1c8] sm:$0xf]  ;;  %v1342_v53 = vld [vmem:[#allocation2 + $0xcc] sm:$0xf]  ;;  %v1580_v55 = vor.u32 %v1315_v43, %v927_v44 }
  0x27   :  { %465 = vmatpush.bf16.msra.mxu0 %v950_v16  ;;  %v1376_v52 = vld [vmem:[#allocation2 + $0x1d4] sm:$0xf0]  ;;  %v1039_v54 = vld [vmem:[#allocation2 + $0xd8] sm:$0xf0]  ;;  %v1374_v56 = vld [vmem:[#allocation2 + $0x1cc] sm:$0xf]  ;;  %v1038_v58 = vor.u32 %v1344_v48, %v1037_v47 }
  0x28   :  { %479 = vmatpush.bf16.msra.mxu1 %v1078_v20  ;;  %v1167_v57 = vld [vmem:[#allocation2 + $0x1d8] sm:$0xf0]  ;;  %v1166_v59 = vor.u32 %v1376_v52, %v1165_v49  ;;  %v1042_v60 = vor.u32 %v1342_v53, %v1039_v54  ;;  %v1021_v61 = vld [vmem:[#allocation2 + $0xa8] sm:$0xf]  ;;  %v1340_v62 = vld [vmem:[#allocation2 + $0xb4] sm:$0xf0] }
  0x29   :  { %493 = vmatpush.bf16.msra.mxu2 %v954_v21  ;;  %v1149_v63 = vld [vmem:[#allocation2 + $0x1a8] sm:$0xf]  ;;  %v1170_v0 = vor.u32 %v1374_v56, %v1167_v57  ;;  %v1372_v1 = vld [vmem:[#allocation2 + $0x1b4] sm:$0xf0]  ;;  %v1338_v2 = vld [vmem:[#allocation2 + $0xac] sm:$0xf]  ;;  %v1022_v6 = vor.u32 %v1340_v62, %v1021_v61 }
  0x2a   :  { %507 = vmatpush.bf16.msra.mxu3 %v1082_v25  ;;  %v1023_v3 = vld [vmem:[#allocation2 + $0xb8] sm:$0xf0]  ;;  %v1370_v4 = vld [vmem:[#allocation2 + $0x1ac] sm:$0xf]  ;;  %v1150_v7 = vor.u32 %v1372_v1, %v1149_v63  ;;  %v1005_v9 = vld [vmem:[#allocation2 + $0x88] sm:$0xf] }
  0x2b   :  { %466 = vmatpush.bf16.msra.mxu0 %v934_v32  ;;  %v1151_v5 = vld [vmem:[#allocation2 + $0x1b8] sm:$0xf0]  ;;  %v1026_v8 = vor.u32 %v1338_v2, %v1023_v3  ;;  %v1336_v10 = vld [vmem:[#allocation2 + $0x94] sm:$0xf0]  ;;  %v1133_v11 = vld [vmem:[#allocation2 + $0x188] sm:$0xf] }
  0x2c   :  { %480 = vmatpush.bf16.msra.mxu1 %v1062_v36  ;;  %v1154_v12 = vor.u32 %v1370_v4, %v1151_v5  ;;  %v1368_v13 = vld [vmem:[#allocation2 + $0x194] sm:$0xf0]  ;;  %v1334_v14 = vld [vmem:[#allocation2 + $0x8c] sm:$0xf]  ;;  %v1007_v15 = vld [vmem:[#allocation2 + $0x98] sm:$0xf0]  ;;  %v1006_v18 = vor.u32 %v1336_v10, %v1005_v9 }
  0x2d   :  { %494 = vmatpush.bf16.msra.mxu2 %v938_v37  ;;  %v1366_v16 = vld [vmem:[#allocation2 + $0x18c] sm:$0xf]  ;;  %v1135_v17 = vld [vmem:[#allocation2 + $0x198] sm:$0xf0]  ;;  %v1134_v19 = vor.u32 %v1368_v13, %v1133_v11  ;;  %v1010_v20 = vor.u32 %v1334_v14, %v1007_v15  ;;  %v989_v21 = vld [vmem:[#allocation2 + $0x68] sm:$0xf] }
  0x2e   :  { %508 = vmatpush.bf16.msra.mxu3 %v1066_v41  ;;  %467 = vmatmul.bf16.vlgmr.msra.gmra.mxu0 %v1578_v51  ;;  %v1332_v22 = vld [vmem:[#allocation2 + $0x74] sm:$0xf0]  ;;  %v1117_v23 = vld [vmem:[#allocation2 + $0x168] sm:$0xf]  ;;  %v1138_v24 = vor.u32 %v1366_v16, %v1135_v17  ;;  %v1330_v26 = vld [vmem:[#allocation2 + $0x6c] sm:$0xf] }
  0x2f   :  { %515 = vmatpush.bf16.msrb.mxu0 %v1054_v42  ;;  %481 = vmatmul.bf16.vlgmr.msra.gmra.mxu1 %v1580_v55  ;;  %v1364_v25 = vld [vmem:[#allocation2 + $0x174] sm:$0xf0]  ;;  %v991_v27 = vld [vmem:[#allocation2 + $0x78] sm:$0xf0]  ;;  %v1362_v28 = vld [vmem:[#allocation2 + $0x16c] sm:$0xf]  ;;  %v990_v30 = vor.u32 %v1332_v22, %v989_v21 }
  0x30   :  { %529 = vmatpush.bf16.msrb.mxu1 %v1182_v45  ;;  %495 = vmatmul.bf16.vlgmr.msra.gmra.mxu2 %v1578_v51  ;;  %v1119_v29 = vld [vmem:[#allocation2 + $0x178] sm:$0xf0]  ;;  %v1118_v31 = vor.u32 %v1364_v25, %v1117_v23  ;;  %v994_v32 = vor.u32 %v1330_v26, %v991_v27  ;;  %v973_v33 = vld [vmem:[#allocation2 + $0x48] sm:$0xf]  ;;  %v1328_v34 = vld [vmem:[#allocation2 + $0x54] sm:$0xf0] }
  0x31   :  { %543 = vmatpush.bf16.msrb.mxu2 %v1058_v46  ;;  %509 = vmatmul.bf16.vlgmr.msra.gmra.mxu3 %v1580_v55  ;;  %v1101_v35 = vld [vmem:[#allocation2 + $0x148] sm:$0xf]  ;;  %v1122_v36 = vor.u32 %v1362_v28, %v1119_v29  ;;  %v1360_v37 = vld [vmem:[#allocation2 + $0x154] sm:$0xf0]  ;;  %v1326_v38 = vld [vmem:[#allocation2 + $0x4c] sm:$0xf]  ;;  %v974_v42 = vor.u32 %v1328_v34, %v973_v33 }
  0x32   :  { %557 = vmatpush.bf16.msrb.mxu3 %v1186_v50  ;;  %v975_v39 = vld [vmem:[#allocation2 + $0x58] sm:$0xf0]  ;;  %v1358_v40 = vld [vmem:[#allocation2 + $0x14c] sm:$0xf]  ;;  %v1102_v43 = vor.u32 %v1360_v37, %v1101_v35  ;;  %v957_v45 = vld [vmem:[#allocation2 + $0x28] sm:$0xf] }
  0x33   :  { %516 = vmatpush.bf16.msrb.mxu0 %v1038_v58  ;;  %v1103_v41 = vld [vmem:[#allocation2 + $0x158] sm:$0xf0]  ;;  %v978_v44 = vor.u32 %v1326_v38, %v975_v39  ;;  %v1324_v46 = vld [vmem:[#allocation2 + $0x34] sm:$0xf0]  ;;  %v1085_v47 = vld [vmem:[#allocation2 + $0x128] sm:$0xf] }
  0x34   :  { %530 = vmatpush.bf16.msrb.mxu1 %v1166_v59  ;;  %v1106_v48 = vor.u32 %v1358_v40, %v1103_v41  ;;  %v1356_v49 = vld [vmem:[#allocation2 + $0x134] sm:$0xf0]  ;;  %v1322_v50 = vld [vmem:[#allocation2 + $0x2c] sm:$0xf]  ;;  %v959_v52 = vld [vmem:[#allocation2 + $0x38] sm:$0xf0]  ;;  %v958_v56 = vor.u32 %v1324_v46, %v957_v45 }
  0x35   :  { %544 = vmatpush.bf16.msrb.mxu2 %v1042_v60  ;;  %v1354_v53 = vld [vmem:[#allocation2 + $0x12c] sm:$0xf]  ;;  %v1087_v54 = vld [vmem:[#allocation2 + $0x138] sm:$0xf0]  ;;  %v1086_v57 = vor.u32 %v1356_v49, %v1085_v47  ;;  %v962_v58 = vor.u32 %v1322_v50, %v959_v52  ;;  %v941_v59 = vld [vmem:[#allocation2 + $0x8] sm:$0xf] }
  0x36   :  { %558 = vmatpush.bf16.msrb.mxu3 %v1170_v0  ;;  %v1320_v60 = vld [vmem:[#allocation2 + $0x14] sm:$0xf0]  ;;  %v1069_v61 = vld [vmem:[#allocation2 + $0x108] sm:$0xf]  ;;  %v1090_v62 = vor.u32 %v1354_v53, %v1087_v54  ;;  %v1318_v0 = vld [vmem:[#allocation2 + $0xc] sm:$0xf] }
  0x37   :  { %517 = vmatpush.bf16.msrb.mxu0 %v1022_v6  ;;  %v1352_v63 = vld [vmem:[#allocation2 + $0x114] sm:$0xf0]  ;;  %v943_v1 = vld [vmem:[#allocation2 + $0x18] sm:$0xf0]  ;;  %v1350_v2 = vld [vmem:[#allocation2 + $0x10c] sm:$0xf]  ;;  %v942_v4 = vor.u32 %v1320_v60, %v941_v59 }
  0x38   :  { %531 = vmatpush.bf16.msrb.mxu1 %v1150_v7  ;;  %v1071_v3 = vld [vmem:[#allocation2 + $0x118] sm:$0xf0]  ;;  %v1070_v5 = vor.u32 %v1352_v63, %v1069_v61  ;;  %v946_v6 = vor.u32 %v1318_v0, %v943_v1  ;;  %v1387_v10 = vld [vmem:[#allocation5 + $0x30] sm:$0xff]  ;;  %v1386_v11 = vld [vmem:[#allocation5 + $0x28] sm:$0xff]  ;;  %s909_s18 = sshll.u32 %s1610_s5, 4  ;;  %s1528_s19 = smov 128   ;;  %s910_s18 = int_to_ptr.hbm [resolvable:$true] %s909_s18 }
  0x39   :  { %545 = vmatpush.bf16.msrb.mxu2 %v1026_v8  ;;  %v1074_v7 = vor.u32 %v1350_v2, %v1071_v3  ;;  %v1388_v8 = vld [vmem:[#allocation5 + $0x38] sm:$0xff]  ;;  %v1385_v13 = vld [vmem:[#allocation5 + $0x20] sm:$0xff]  ;;  %v1394_v14 = vld [vmem:[#allocation5 + $0x68] sm:$0xff]  ;;  %s1529_s20 = smov 8  }
  0x3a   :  { %559 = vmatpush.bf16.msrb.mxu3 %v1154_v12  ;;  %v1396_v9 = vld [vmem:[#allocation5 + $0x78] sm:$0xff]  ;;  %v1395_v12 = vld [vmem:[#allocation5 + $0x70] sm:$0xff]  ;;  %v1393_v16 = vld [vmem:[#allocation5 + $0x60] sm:$0xff] }
  0x3b   :  { %518 = vmatpush.bf16.msrb.mxu0 %v1006_v18  ;;  %v1384_v15 = vld [vmem:[#allocation5 + $0x18] sm:$0xff]  ;;  %v1383_v17 = vld [vmem:[#allocation5 + $0x10] sm:$0xff]  ;;  %v1390_v21 = vld [vmem:[#allocation5 + $0x48] sm:$0xff] }
  0x3c   :  { %532 = vmatpush.bf16.msrb.mxu1 %v1134_v19  ;;  %v1392_v18 = vld [vmem:[#allocation5 + $0x58] sm:$0xff]  ;;  %v1391_v19 = vld [vmem:[#allocation5 + $0x50] sm:$0xff]  ;;  %v1389_v23 = vld [vmem:[#allocation5 + $0x40] sm:$0xff] }
  0x3d   :  { %546 = vmatpush.bf16.msrb.mxu2 %v1010_v20  ;;  %v1404_v20 = vld [vmem:[#allocation5 + $0xb8] sm:$0xff]  ;;  %v1403_v22 = vld [vmem:[#allocation5 + $0xb0] sm:$0xff]  ;;  %v1402_v25 = vld [vmem:[#allocation5 + $0xa8] sm:$0xff] }
  0x3e   :  { %560 = vmatpush.bf16.msrb.mxu3 %v1138_v24  ;;  %v1412_v24 = vld [vmem:[#allocation5 + $0xf8] sm:$0xff]  ;;  %v1593_v26 = vld [vmem:[%s1607_s2] sm:$0xf]  ;;  %v1411_v27 = vld [vmem:[#allocation5 + $0xf0] sm:$0xff] }
  0x3f   :  { %519 = vmatpush.bf16.msrb.mxu0 %v990_v30  ;;  %v121_v28 = vperm.slane %v1593_v26, 0  ;;  %v1401_v29 = vld [vmem:[#allocation5 + $0xa0] sm:$0xff]  ;;  %v1400_v34 = vld [vmem:[#allocation5 + $0x98] sm:$0xff]  ;;  %v122_v35 = vperm.slane %v1593_v26, 1  ;;  %v1399_v40 = vld [vmem:[#allocation5 + $0x90] sm:$0xff]  ;;  %v123_v1 = vperm.slane %v1593_v26, 2 }
  0x40   :  { %533 = vmatpush.bf16.msrb.mxu1 %v1118_v31  ;;  %v1409_v37 = vld [vmem:[#allocation5 + $0xe0] sm:$0xff]  ;;  %v1408_v45 = vld [vmem:[#allocation5 + $0xd8] sm:$0xff]  ;;  %v1398_v47 = vld [vmem:[#allocation5 + $0x88] sm:$0xff] }
  0x41   :  { %547 = vmatpush.bf16.msrb.mxu2 %v994_v32  ;;  %v1410_v32 = vld [vmem:[#allocation5 + $0xe8] sm:$0xff]  ;;  %v1407_v50 = vld [vmem:[#allocation5 + $0xd0] sm:$0xff]  ;;  %v1397_v54 = vld [vmem:[#allocation5 + $0x80] sm:$0xff] }
  0x42   :  { %561 = vmatpush.bf16.msrb.mxu3 %v1122_v36  ;;  %v1405_v60 = vld [vmem:[#allocation5 + $0xc0] sm:$0xff] }
  0x43   :  { %520 = vmatpush.bf16.msrb.mxu0 %v974_v42 }
  0x44   :  { %534 = vmatpush.bf16.msrb.mxu1 %v1102_v43 }
  0x45   :  { %548 = vmatpush.bf16.msrb.mxu2 %v978_v44 }
  0x46   :  { %562 = vmatpush.bf16.msrb.mxu3 %v1106_v48 }
  0x47   :  { %521 = vmatpush.bf16.msrb.mxu0 %v958_v56 }
  0x48   :  { %535 = vmatpush.bf16.msrb.mxu1 %v1086_v57  ;;  %v1406_v57 = vld [vmem:[#allocation5 + $0xc8] sm:$0xff] }
  0x49   :  { %549 = vmatpush.bf16.msrb.mxu2 %v962_v58 }
  0x4a   :  { %563 = vmatpush.bf16.msrb.mxu3 %v1090_v62 }
  0x4b   :  { %522 = vmatpush.bf16.msrb.mxu0 %v942_v4 }
  0x4c   :  { %536 = vmatpush.bf16.msrb.mxu1 %v1070_v5  ;;  %v124_v5 = vperm.slane %v1593_v26, 3 }
  0x4d   :  { %550 = vmatpush.bf16.msrb.mxu2 %v946_v6 }
  0x4e   :  { %564 = vmatpush.bf16.msrb.mxu3 %v1074_v7  ;;  %523 = vmatmul.bf16.vlgmr.msrb.gmra.mxu0 %v1578_v51 }
  0x4f   :  { %843 = vmatpush.bf16.msra.mxu0 %v1388_v8  ;;  %537 = vmatmul.bf16.vlgmr.msrb.gmra.mxu1 %v1580_v55 }
  0x50   :  { %857 = vmatpush.bf16.msra.mxu1 %v1396_v9  ;;  %551 = vmatmul.bf16.vlgmr.msrb.gmra.mxu2 %v1578_v51  ;;  %v1382_v51 = vld [vmem:[#allocation5 + $0x8] sm:$0xff] }
  0x51   :  { %565 = vmatmul.bf16.vlgmr.msrb.gmra.mxu3 %v1580_v55  ;;  %v1381_v55 = vld [vmem:[#allocation5] sm:$0xff]  ;;  %871 = vmatpush.bf16.msra.mxu2 %v1404_v20 }
  0x52   :  { %885 = vmatpush.bf16.msra.mxu3 %v1412_v24 }
  0x53   :  { %844 = vmatpush.bf16.msra.mxu0 %v1387_v10 }
  0x54   :  { %858 = vmatpush.bf16.msra.mxu1 %v1395_v12 }
  0x55   :  { %872 = vmatpush.bf16.msra.mxu2 %v1403_v22 }
  0x56   :  { %886 = vmatpush.bf16.msra.mxu3 %v1411_v27 }
  0x57   :  { %845 = vmatpush.bf16.msra.mxu0 %v1386_v11 }
  0x58   :  { %859 = vmatpush.bf16.msra.mxu1 %v1394_v14 }
  0x59   :  { %873 = vmatpush.bf16.msra.mxu2 %v1402_v25 }
  0x5a   :  { %887 = vmatpush.bf16.msra.mxu3 %v1410_v32 }
  0x5b   :  { %846 = vmatpush.bf16.msra.mxu0 %v1385_v13 }
  0x5c   :  { %860 = vmatpush.bf16.msra.mxu1 %v1393_v16 }
  0x5d   :  { %874 = vmatpush.bf16.msra.mxu2 %v1401_v29 }
  0x5e   :  { %888 = vmatpush.bf16.msra.mxu3 %v1409_v37 }
  0x5f   :  { %847 = vmatpush.bf16.msra.mxu0 %v1384_v15 }
  0x60   :  { %861 = vmatpush.bf16.msra.mxu1 %v1392_v18 }
  0x61   :  { %875 = vmatpush.bf16.msra.mxu2 %v1400_v34 }
  0x62   :  { %889 = vmatpush.bf16.msra.mxu3 %v1408_v45 }
  0x63   :  { %848 = vmatpush.bf16.msra.mxu0 %v1383_v17 }
  0x64   :  { %862 = vmatpush.bf16.msra.mxu1 %v1391_v19 }
  0x65   :  { %876 = vmatpush.bf16.msra.mxu2 %v1399_v40 }
  0x66   :  { %890 = vmatpush.bf16.msra.mxu3 %v1407_v50 }
  0x67   :  { %849 = vmatpush.bf16.msra.mxu0 %v1382_v51 }
  0x68   :  { %863 = vmatpush.bf16.msra.mxu1 %v1390_v21 }
  0x69   :  { %877 = vmatpush.bf16.msra.mxu2 %v1398_v47 }
  0x6a   :  { %891 = vmatpush.bf16.msra.mxu3 %v1406_v57 }
  0x6b   :  { %850 = vmatpush.bf16.msra.mxu0 %v1381_v55 }
  0x6c   :  { %864 = vmatpush.bf16.msra.mxu1 %v1389_v23  ;;  %v1422_v23 = vld [vmem:[%s1609_s4] ss:$0 sm:$0xff]  ;;  %s1527_s4 = smov [#allocation7]  }
  0x6d   :  { %878 = vmatpush.bf16.msra.mxu2 %v1397_v54  ;;  %s907_s15 = sshll.u32 %s1527_s4, 4  ;;  %s908_s15 = int_to_ptr.vmem [resolvable:$true] %s907_s15 }
  0x6e   :  { %892 = vmatpush.bf16.msra.mxu3 %v1405_v60 }
  0xab   :  { %v468_v30 = vpop.f32.mrf.mxu0 }
  0xac   :  { %v482_v31 = vpop.f32.mrf.mxu1  ;;  %v469_v33 = vadd.f32 %v468_v30, %v121_v28 }
  0xae   :  { %v483_v39 = vadd.f32 %v482_v31, %v469_v33 }
  0xb0   :  { %1423 = vtanh.f32 %v483_v39 }
  0xb3   :  { %v496_v36 = vpop.f32.mrf.mxu2  ;;  %v470_v42 = vpop.f32.mrf.mxu0 }
  0xb4   :  { %v510_v38 = vpop.f32.mrf.mxu3  ;;  %v497_v41 = vadd.f32 %v496_v36, %v122_v35  ;;  %v471_v43 = vadd.f32 %v470_v42, %v121_v28  ;;  %v484_v44 = vpop.f32.mrf.mxu1 }
  0xb6   :  { %v485_v46 = vadd.f32 %v484_v44, %v471_v43  ;;  %v511_v48 = vadd.f32 %v510_v38, %v497_v41  ;;  %v1424_v58 = vpop.eup %1423 }
  0xb8   :  { %1425 = vtanh.f32 %v485_v46 }
  0xb9   :  { %1427 = vtanh.f32 %v511_v48 }
  0xbb   :  { %v498_v49 = vpop.f32.mrf.mxu2 }
  0xbc   :  { %v499_v52 = vadd.f32 %v498_v49, %v122_v35  ;;  %v512_v53 = vpop.f32.mrf.mxu3 }
  0xbe   :  { %v513_v56 = vadd.f32 %v512_v53, %v499_v52  ;;  %v1426_v59 = vpop.eup %1425 }
  0xbf   :  { %v579_v61 = vpack.c.bf16 %v1426_v59, %v1424_v58  ;;  %v1428_v62 = vpop.eup %1427 }
  0xc0   :  { %1429 = vtanh.f32 %v513_v56 }
  0xc1   :  { %851 = vmatmul.bf16.vlgmr.msra.gmra.mxu0 %v579_v61 }
  0xc6   :  { %v1430_v63 = vpop.eup %1429 }
  0xc7   :  { %v580_v0 = vpack.c.bf16 %v1430_v63, %v1428_v62 }
  0xc9   :  { %865 = vmatmul.bf16.vlgmr.msra.gmra.mxu1 %v580_v0 }
  0xcb   :  { %v524_v2 = vpop.f32.mrf.mxu0 }
  0xcc   :  { %v538_v3 = vpop.f32.mrf.mxu1  ;;  %v525_v4 = vadd.f32 %v524_v2, %v123_v1 }
  0xce   :  { %v539_v7 = vadd.f32 %v538_v3, %v525_v4 }
  0xd0   :  { %1431 = vtanh.f32 %v539_v7 }
  0xd3   :  { %v552_v6 = vpop.f32.mrf.mxu2  ;;  %v526_v9 = vpop.f32.mrf.mxu0 }
  0xd4   :  { %v566_v8 = vpop.f32.mrf.mxu3  ;;  %v527_v10 = vadd.f32 %v526_v9, %v123_v1  ;;  %v540_v11 = vpop.f32.mrf.mxu1  ;;  %v553_v12 = vadd.f32 %v552_v6, %v124_v5 }
  0xd6   :  { %v541_v13 = vadd.f32 %v540_v11, %v527_v10  ;;  %v567_v14 = vadd.f32 %v566_v8, %v553_v12  ;;  %v1432_v18 = vpop.eup %1431 }
  0xd8   :  { %1433 = vtanh.f32 %v541_v13 }
  0xd9   :  { %1435 = vtanh.f32 %v567_v14 }
  0xdb   :  { %v554_v15 = vpop.f32.mrf.mxu2 }
  0xdc   :  { %v555_v16 = vadd.f32 %v554_v15, %v124_v5  ;;  %v568_v17 = vpop.f32.mrf.mxu3 }
  0xde   :  { %v569_v51 = vadd.f32 %v568_v17, %v555_v16  ;;  %v1434_v19 = vpop.eup %1433 }
  0xdf   :  { %v581_v55 = vpack.c.bf16 %v1434_v19, %v1432_v18  ;;  %v1436_v20 = vpop.eup %1435 }
  0xe0   :  { %1437 = vtanh.f32 %v569_v51 }
  0xe1   :  { %879 = vmatmul.bf16.vlgmr.msra.gmra.mxu2 %v581_v55 }
  0xe6   :  { %v1438_v21 = vpop.eup %1437 }
  0xe7   :  { %v582_v22 = vpack.c.bf16 %v1438_v21, %v1436_v20 }
  0xe9   :  { %893 = vmatmul.bf16.vlgmr.msra.gmra.mxu3 %v582_v22 }
 0x13e   :  { %v852_v24 = vpop.f32.mrf.mxu0 }
 0x13f   :  { %v853_v26 = vadd.f32 %v1422_v23, %v852_v24 }
 0x146   :  { %v866_v25 = vpop.f32.mrf.mxu1  ;;  %v854_v30 = vpop.f32.mrf.mxu0 }
 0x147   :  { %v867_v28 = vadd.f32 %v866_v25, %v853_v26  ;;  %v855_v34 = vadd.f32 %v1422_v23, %v854_v30 }
 0x14e   :  { %v868_v33 = vpop.f32.mrf.mxu1 }
 0x14f   :  { %v869_v36 = vadd.f32 %v868_v33, %v855_v34 }
 0x164   :  { %v880_v27 = vpop.f32.mrf.mxu2 }
 0x165   :  { %v881_v29 = vadd.f32 %v880_v27, %v867_v28 }
 0x16c   :  { %v894_v31 = vpop.f32.mrf.mxu3  ;;  %v882_v35 = vpop.f32.mrf.mxu2 }
 0x16d   :  { %v895_v32 = vadd.f32 %v894_v31, %v881_v29  ;;  %v883_v37 = vadd.f32 %v882_v35, %v869_v36 }
 0x16f   :  { %1439 = vtanh.f32 %v895_v32 }
 0x174   :  { %v896_v38 = vpop.f32.mrf.mxu3 }
 0x175   :  { %v1440_v39 = vpop.eup %1439  ;;  %v897_v40 = vadd.f32 %v896_v38, %v883_v37 }
 0x176   :  { %901 = vst [vmem:[#allocation7] sm:$0xff] %v1440_v39 }
 0x177   :  { %1441 = vtanh.f32 %v897_v40 }
 0x17d   :  { %v1442_v41 = vpop.eup %1441 }
 0x17e   :  { %902 = vst [vmem:[#allocation7 + $0x8] sm:$0xff] %v1442_v41 }
 0x17f   :  { %915 = dma.vmem_to_hbm [thread:$0]  %s908_s15, 256, %s910_s18, [#allocation4], %s1528_s19, %s1528_s19, %s1529_s20  }
 0x180   :  { %1519 = dma.done.wait [#allocation4], 256  }
 0x181   :  { %1520 = vsyncadd [#allocation4], 4294967040 }
 0x182   :  { %920 = vsyncpa [#allocation3], 1 }
 0x183   :  { %921 = vsyncpa [#allocation6], 1 }
 0x184   :  { %922 = vsyncpa [#allocation4], 1 }

// kernel: _diffusion_dense_impl.1
= control target key start
LH: loop header
LB: loop body
LE: loop exit
PB: predicated region body
PF: predicated region fallthrough
CT: control target
= control target key end

     0   :  { %10 = vsyncpa [#allocation3], 0  ;;  %s1605_s0 = inlined_call_operand.vmem [shape: bf16[16,256], index: 0, kind: input, shape index: {}]   ;;  %s1606_s1 = inlined_call_operand.hbm [shape: bf16[256,512], index: 1, kind: input, shape index: {}]   ;;  %s1607_s2 = inlined_call_operand.vmem [shape: f32[1,512], index: 2, kind: input, shape index: {}]   ;;  %s1608_s3 = inlined_call_operand.hbm [shape: bf16[512,128], index: 3, kind: input, shape index: {}]   ;;  %s1609_s4 = inlined_call_operand.vmem [shape: f32[1,128], index: 4, kind: input, shape index: {}]   ;;  %s1610_s5 = inlined_call_operand.hbm [shape: f32[16,128], index: 5, kind: output, shape index: {}]  }
   0x1   :  { %11 = vsyncpa [#allocation6], 0 }
   0x2   :  { %12 = vsyncpa [#allocation4], 0  ;;  %s19_s20 = sshll.u32 %s1606_s1, 4  ;;  %s1521_s21 = smov [#allocation2]   ;;  %s20_s20 = int_to_ptr.hbm [resolvable:$true] %s19_s20 }
   0x3   :  { %s21_s22 = sshll.u32 %s1521_s21, 4  ;;  %s34_s25 = sshll.u32 %s1608_s3, 4  ;;  %s22_s22 = int_to_ptr.vmem [resolvable:$true] %s21_s22  ;;  %s35_s25 = int_to_ptr.hbm [resolvable:$true] %s34_s25 }
   0x4   :  { %s1522_s26 = smov 256   ;;  %s1523_s27 = smov 16  }
   0x5   :  { %27 = dma.hbm_to_vmem [thread:$0]  %s20_s20, 8192, %s22_s22, [#allocation3], %s1522_s26, %s1522_s26, %s1523_s27  }
   0x6   :  { %s1524_s28 = smov [#allocation5]   ;;  %s1525_s30 = smov 64  }
   0x7   :  { %s36_s29 = sshll.u32 %s1524_s28, 4  ;;  %s1526_s6 = smov 4   ;;  %s37_s29 = int_to_ptr.vmem [resolvable:$true] %s36_s29 }
   0x8   :  { %42 = dma.hbm_to_vmem [thread:$0]  %s35_s25, 4096, %s37_s29, [#allocation6], %s1525_s30, %s1525_s30, %s1526_s6  }
   0x9   :  { %1515 = dma.done.wait [#allocation3], 8192  }
   0xa   :  { %1516 = vsyncadd [#allocation3], 4294959104 }
   0xb   :  { %1517 = dma.done.wait [#allocation6], 4096  }
   0xc   :  { %1518 = vsyncadd [#allocation6], 4294963200  ;;  %v1045_v0 = vld [vmem:[#allocation2 + $0xe0] sm:$0xf]  ;;  %v1347_v1 = vld [vmem:[#allocation2 + $0xec] sm:$0xf0] }
   0xd   :  { %v1173_v2 = vld [vmem:[#allocation2 + $0x1e0] sm:$0xf]  ;;  %v1046_v3 = vor.u32 %v1347_v1, %v1045_v0  ;;  %v1379_v4 = vld [vmem:[#allocation2 + $0x1ec] sm:$0xf0]  ;;  %v1345_v5 = vld [vmem:[#allocation2 + $0xe4] sm:$0xf] }
   0xe   :  { %v1047_v6 = vld [vmem:[#allocation2 + $0xf0] sm:$0xf0]  ;;  %v1174_v7 = vor.u32 %v1379_v4, %v1173_v2  ;;  %v1377_v9 = vld [vmem:[#allocation2 + $0x1e4] sm:$0xf]  ;;  %v1029_v11 = vld [vmem:[#allocation2 + $0xc0] sm:$0xf] }
   0xf   :  { %v1050_v8 = vor.u32 %v1345_v5, %v1047_v6  ;;  %v1175_v10 = vld [vmem:[#allocation2 + $0x1f0] sm:$0xf0]  ;;  %459 = vmatpush.bf16.msra.mxu0 %v1046_v3  ;;  %v1343_v13 = vld [vmem:[#allocation2 + $0xcc] sm:$0xf0]  ;;  %v1157_v14 = vld [vmem:[#allocation2 + $0x1c0] sm:$0xf] }
  0x10   :  { %v1178_v12 = vor.u32 %v1377_v9, %v1175_v10  ;;  %v1375_v15 = vld [vmem:[#allocation2 + $0x1cc] sm:$0xf0]  ;;  %473 = vmatpush.bf16.msra.mxu1 %v1174_v7  ;;  %v1030_v16 = vor.u32 %v1343_v13, %v1029_v11  ;;  %v1341_v18 = vld [vmem:[#allocation2 + $0xc4] sm:$0xf]  ;;  %v1031_v19 = vld [vmem:[#allocation2 + $0xd0] sm:$0xf0] }
  0x11   :  { %487 = vmatpush.bf16.msra.mxu2 %v1050_v8  ;;  %v1158_v17 = vor.u32 %v1375_v15, %v1157_v14  ;;  %v1373_v20 = vld [vmem:[#allocation2 + $0x1c4] sm:$0xf]  ;;  %v1034_v21 = vor.u32 %v1341_v18, %v1031_v19  ;;  %v1159_v22 = vld [vmem:[#allocation2 + $0x1d0] sm:$0xf0]  ;;  %v1013_v23 = vld [vmem:[#allocation2 + $0xa0] sm:$0xf] }
  0x12   :  { %501 = vmatpush.bf16.msra.mxu3 %v1178_v12  ;;  %v1339_v24 = vld [vmem:[#allocation2 + $0xac] sm:$0xf0]  ;;  %v1162_v25 = vor.u32 %v1373_v20, %v1159_v22  ;;  %v1141_v26 = vld [vmem:[#allocation2 + $0x1a0] sm:$0xf]  ;;  %v1337_v28 = vld [vmem:[#allocation2 + $0xa4] sm:$0xf] }
  0x13   :  { %v1371_v27 = vld [vmem:[#allocation2 + $0x1ac] sm:$0xf0]  ;;  %460 = vmatpush.bf16.msra.mxu0 %v1030_v16  ;;  %v1014_v29 = vor.u32 %v1339_v24, %v1013_v23  ;;  %v1015_v30 = vld [vmem:[#allocation2 + $0xb0] sm:$0xf0]  ;;  %v1369_v31 = vld [vmem:[#allocation2 + $0x1a4] sm:$0xf] }
  0x14   :  { %v1143_v32 = vld [vmem:[#allocation2 + $0x1b0] sm:$0xf0]  ;;  %474 = vmatpush.bf16.msra.mxu1 %v1158_v17  ;;  %v1142_v33 = vor.u32 %v1371_v27, %v1141_v26  ;;  %v1018_v34 = vor.u32 %v1337_v28, %v1015_v30  ;;  %v997_v35 = vld [vmem:[#allocation2 + $0x80] sm:$0xf]  ;;  %v1335_v36 = vld [vmem:[#allocation2 + $0x8c] sm:$0xf0] }
  0x15   :  { %488 = vmatpush.bf16.msra.mxu2 %v1034_v21  ;;  %v1125_v37 = vld [vmem:[#allocation2 + $0x180] sm:$0xf]  ;;  %v1146_v38 = vor.u32 %v1369_v31, %v1143_v32  ;;  %v1367_v39 = vld [vmem:[#allocation2 + $0x18c] sm:$0xf0]  ;;  %v1333_v40 = vld [vmem:[#allocation2 + $0x84] sm:$0xf]  ;;  %v998_v44 = vor.u32 %v1335_v36, %v997_v35 }
  0x16   :  { %502 = vmatpush.bf16.msra.mxu3 %v1162_v25  ;;  %v999_v41 = vld [vmem:[#allocation2 + $0x90] sm:$0xf0]  ;;  %v1365_v42 = vld [vmem:[#allocation2 + $0x184] sm:$0xf]  ;;  %v1126_v45 = vor.u32 %v1367_v39, %v1125_v37  ;;  %v981_v47 = vld [vmem:[#allocation2 + $0x60] sm:$0xf] }
  0x17   :  { %v1127_v43 = vld [vmem:[#allocation2 + $0x190] sm:$0xf0]  ;;  %461 = vmatpush.bf16.msra.mxu0 %v1014_v29  ;;  %v1002_v46 = vor.u32 %v1333_v40, %v999_v41  ;;  %v1331_v48 = vld [vmem:[#allocation2 + $0x6c] sm:$0xf0]  ;;  %v1109_v49 = vld [vmem:[#allocation2 + $0x160] sm:$0xf] }
  0x18   :  { %475 = vmatpush.bf16.msra.mxu1 %v1142_v33  ;;  %v1130_v50 = vor.u32 %v1365_v42, %v1127_v43  ;;  %v1363_v51 = vld [vmem:[#allocation2 + $0x16c] sm:$0xf0]  ;;  %v1329_v52 = vld [vmem:[#allocation2 + $0x64] sm:$0xf]  ;;  %v983_v53 = vld [vmem:[#allocation2 + $0x70] sm:$0xf0]  ;;  %v982_v56 = vor.u32 %v1331_v48, %v981_v47 }
  0x19   :  { %489 = vmatpush.bf16.msra.mxu2 %v1018_v34  ;;  %v1361_v54 = vld [vmem:[#allocation2 + $0x164] sm:$0xf]  ;;  %v1111_v55 = vld [vmem:[#allocation2 + $0x170] sm:$0xf0]  ;;  %v1110_v57 = vor.u32 %v1363_v51, %v1109_v49  ;;  %v986_v58 = vor.u32 %v1329_v52, %v983_v53  ;;  %v965_v59 = vld [vmem:[#allocation2 + $0x40] sm:$0xf] }
  0x1a   :  { %503 = vmatpush.bf16.msra.mxu3 %v1146_v38  ;;  %v1327_v60 = vld [vmem:[#allocation2 + $0x4c] sm:$0xf0]  ;;  %v1093_v61 = vld [vmem:[#allocation2 + $0x140] sm:$0xf]  ;;  %v1114_v62 = vor.u32 %v1361_v54, %v1111_v55  ;;  %v1325_v0 = vld [vmem:[#allocation2 + $0x44] sm:$0xf] }
  0x1b   :  { %462 = vmatpush.bf16.msra.mxu0 %v998_v44  ;;  %v1359_v63 = vld [vmem:[#allocation2 + $0x14c] sm:$0xf0]  ;;  %v967_v1 = vld [vmem:[#allocation2 + $0x50] sm:$0xf0]  ;;  %v1357_v2 = vld [vmem:[#allocation2 + $0x144] sm:$0xf]  ;;  %v966_v4 = vor.u32 %v1327_v60, %v965_v59 }
  0x1c   :  { %476 = vmatpush.bf16.msra.mxu1 %v1126_v45  ;;  %v1095_v3 = vld [vmem:[#allocation2 + $0x150] sm:$0xf0]  ;;  %v1094_v5 = vor.u32 %v1359_v63, %v1093_v61  ;;  %v970_v6 = vor.u32 %v1325_v0, %v967_v1  ;;  %v949_v7 = vld [vmem:[#allocation2 + $0x20] sm:$0xf]  ;;  %v1323_v8 = vld [vmem:[#allocation2 + $0x2c] sm:$0xf0] }
  0x1d   :  { %490 = vmatpush.bf16.msra.mxu2 %v1002_v46  ;;  %v1077_v9 = vld [vmem:[#allocation2 + $0x120] sm:$0xf]  ;;  %v1098_v10 = vor.u32 %v1357_v2, %v1095_v3  ;;  %v1355_v11 = vld [vmem:[#allocation2 + $0x12c] sm:$0xf0]  ;;  %v1321_v12 = vld [vmem:[#allocation2 + $0x24] sm:$0xf]  ;;  %v950_v16 = vor.u32 %v1323_v8, %v949_v7 }
  0x1e   :  { %504 = vmatpush.bf16.msra.mxu3 %v1130_v50  ;;  %v951_v13 = vld [vmem:[#allocation2 + $0x30] sm:$0xf0]  ;;  %v1353_v14 = vld [vmem:[#allocation2 + $0x124] sm:$0xf]  ;;  %v933_v17 = vld [vmem:[#allocation2] sm:$0xf]  ;;  %v1078_v20 = vor.u32 %v1355_v11, %v1077_v9 }
  0x1f   :  { %463 = vmatpush.bf16.msra.mxu0 %v982_v56  ;;  %v1079_v15 = vld [vmem:[#allocation2 + $0x130] sm:$0xf0]  ;;  %v1319_v18 = vld [vmem:[#allocation2 + $0xc] sm:$0xf0]  ;;  %v1061_v19 = vld [vmem:[#allocation2 + $0x100] sm:$0xf]  ;;  %v954_v21 = vor.u32 %v1321_v12, %v951_v13 }
  0x20   :  { %477 = vmatpush.bf16.msra.mxu1 %v1110_v57  ;;  %v1351_v22 = vld [vmem:[#allocation2 + $0x10c] sm:$0xf0]  ;;  %v1317_v23 = vld [vmem:[#allocation2 + $0x4] sm:$0xf]  ;;  %v935_v24 = vld [vmem:[#allocation2 + $0x10] sm:$0xf0]  ;;  %v1082_v25 = vor.u32 %v1353_v14, %v1079_v15  ;;  %v934_v32 = vor.u32 %v1319_v18, %v933_v17 }
  0x21   :  { %491 = vmatpush.bf16.msra.mxu2 %v986_v58  ;;  %v1349_v26 = vld [vmem:[#allocation2 + $0x104] sm:$0xf]  ;;  %v1063_v27 = vld [vmem:[#allocation2 + $0x110] sm:$0xf0]  ;;  %v1053_v28 = vld [vmem:[#allocation2 + $0xe8] sm:$0xf]  ;;  %v1062_v36 = vor.u32 %v1351_v22, %v1061_v19  ;;  %v938_v37 = vor.u32 %v1317_v23, %v935_v24 }
  0x22   :  { %505 = vmatpush.bf16.msra.mxu3 %v1114_v62  ;;  %v1348_v29 = vld [vmem:[#allocation2 + $0xf4] sm:$0xf0]  ;;  %v1181_v30 = vld [vmem:[#allocation2 + $0x1e8] sm:$0xf]  ;;  %v1346_v33 = vld [vmem:[#allocation2 + $0xec] sm:$0xf]  ;;  %v1066_v41 = vor.u32 %v1349_v26, %v1063_v27 }
  0x23   :  { %464 = vmatpush.bf16.msra.mxu0 %v966_v4  ;;  %v1380_v31 = vld [vmem:[#allocation2 + $0x1f4] sm:$0xf0]  ;;  %v1055_v34 = vld [vmem:[#allocation2 + $0xf8] sm:$0xf0]  ;;  %v1378_v35 = vld [vmem:[#allocation2 + $0x1ec] sm:$0xf]  ;;  %v1054_v42 = vor.u32 %v1348_v29, %v1053_v28 }
  0x24   :  { %478 = vmatpush.bf16.msra.mxu1 %v1094_v5  ;;  %v1183_v38 = vld [vmem:[#allocation2 + $0x1f8] sm:$0xf0]  ;;  %v925_v39 = vld [vmem:[%s1605_s0] sm:$0xf]  ;;  %v1316_v40 = vld [vmem:[%s1605_s0 + $0x4] sm:$0xf0]  ;;  %v1182_v45 = vor.u32 %v1380_v31, %v1181_v30  ;;  %v1058_v46 = vor.u32 %v1346_v33, %v1055_v34 }
  0x25   :  { %492 = vmatpush.bf16.msra.mxu2 %v970_v6  ;;  %v1315_v43 = vld [vmem:[%s1605_s0 + $0x4] sm:$0xf]  ;;  %v927_v44 = vld [vmem:[%s1605_s0 + $0x8] sm:$0xf0]  ;;  %v1037_v47 = vld [vmem:[#allocation2 + $0xc8] sm:$0xf]  ;;  %v1186_v50 = vor.u32 %v1378_v35, %v1183_v38  ;;  %v1578_v51 = vor.u32 %v1316_v40, %v925_v39 }
  0x26   :  { %506 = vmatpush.bf16.msra.mxu3 %v1098_v10  ;;  %v1344_v48 = vld [vmem:[#allocation2 + $0xd4] sm:$0xf0]  ;;  %v1165_v49 = vld [vmem:[#allocation2 + $0x1c8] sm:$0xf]  ;;  %v1342_v53 = vld [vmem:[#allocation2 + $0xcc] sm:$0xf]  ;;  %v1580_v55 = vor.u32 %v1315_v43, %v927_v44 }
  0x27   :  { %465 = vmatpush.bf16.msra.mxu0 %v950_v16  ;;  %v1376_v52 = vld [vmem:[#allocation2 + $0x1d4] sm:$0xf0]  ;;  %v1039_v54 = vld [vmem:[#allocation2 + $0xd8] sm:$0xf0]  ;;  %v1374_v56 = vld [vmem:[#allocation2 + $0x1cc] sm:$0xf]  ;;  %v1038_v58 = vor.u32 %v1344_v48, %v1037_v47 }
  0x28   :  { %479 = vmatpush.bf16.msra.mxu1 %v1078_v20  ;;  %v1167_v57 = vld [vmem:[#allocation2 + $0x1d8] sm:$0xf0]  ;;  %v1166_v59 = vor.u32 %v1376_v52, %v1165_v49  ;;  %v1042_v60 = vor.u32 %v1342_v53, %v1039_v54  ;;  %v1021_v61 = vld [vmem:[#allocation2 + $0xa8] sm:$0xf]  ;;  %v1340_v62 = vld [vmem:[#allocation2 + $0xb4] sm:$0xf0] }
  0x29   :  { %493 = vmatpush.bf16.msra.mxu2 %v954_v21  ;;  %v1149_v63 = vld [vmem:[#allocation2 + $0x1a8] sm:$0xf]  ;;  %v1170_v0 = vor.u32 %v1374_v56, %v1167_v57  ;;  %v1372_v1 = vld [vmem:[#allocation2 + $0x1b4] sm:$0xf0]  ;;  %v1338_v2 = vld [vmem:[#allocation2 + $0xac] sm:$0xf]  ;;  %v1022_v6 = vor.u32 %v1340_v62, %v1021_v61 }
  0x2a   :  { %507 = vmatpush.bf16.msra.mxu3 %v1082_v25  ;;  %v1023_v3 = vld [vmem:[#allocation2 + $0xb8] sm:$0xf0]  ;;  %v1370_v4 = vld [vmem:[#allocation2 + $0x1ac] sm:$0xf]  ;;  %v1150_v7 = vor.u32 %v1372_v1, %v1149_v63  ;;  %v1005_v9 = vld [vmem:[#allocation2 + $0x88] sm:$0xf] }
  0x2b   :  { %466 = vmatpush.bf16.msra.mxu0 %v934_v32  ;;  %v1151_v5 = vld [vmem:[#allocation2 + $0x1b8] sm:$0xf0]  ;;  %v1026_v8 = vor.u32 %v1338_v2, %v1023_v3  ;;  %v1336_v10 = vld [vmem:[#allocation2 + $0x94] sm:$0xf0]  ;;  %v1133_v11 = vld [vmem:[#allocation2 + $0x188] sm:$0xf] }
  0x2c   :  { %480 = vmatpush.bf16.msra.mxu1 %v1062_v36  ;;  %v1154_v12 = vor.u32 %v1370_v4, %v1151_v5  ;;  %v1368_v13 = vld [vmem:[#allocation2 + $0x194] sm:$0xf0]  ;;  %v1334_v14 = vld [vmem:[#allocation2 + $0x8c] sm:$0xf]  ;;  %v1007_v15 = vld [vmem:[#allocation2 + $0x98] sm:$0xf0]  ;;  %v1006_v18 = vor.u32 %v1336_v10, %v1005_v9 }
  0x2d   :  { %494 = vmatpush.bf16.msra.mxu2 %v938_v37  ;;  %v1366_v16 = vld [vmem:[#allocation2 + $0x18c] sm:$0xf]  ;;  %v1135_v17 = vld [vmem:[#allocation2 + $0x198] sm:$0xf0]  ;;  %v1134_v19 = vor.u32 %v1368_v13, %v1133_v11  ;;  %v1010_v20 = vor.u32 %v1334_v14, %v1007_v15  ;;  %v989_v21 = vld [vmem:[#allocation2 + $0x68] sm:$0xf] }
  0x2e   :  { %508 = vmatpush.bf16.msra.mxu3 %v1066_v41  ;;  %467 = vmatmul.bf16.vlgmr.msra.gmra.mxu0 %v1578_v51  ;;  %v1332_v22 = vld [vmem:[#allocation2 + $0x74] sm:$0xf0]  ;;  %v1117_v23 = vld [vmem:[#allocation2 + $0x168] sm:$0xf]  ;;  %v1138_v24 = vor.u32 %v1366_v16, %v1135_v17  ;;  %v1330_v26 = vld [vmem:[#allocation2 + $0x6c] sm:$0xf] }
  0x2f   :  { %515 = vmatpush.bf16.msrb.mxu0 %v1054_v42  ;;  %481 = vmatmul.bf16.vlgmr.msra.gmra.mxu1 %v1580_v55  ;;  %v1364_v25 = vld [vmem:[#allocation2 + $0x174] sm:$0xf0]  ;;  %v991_v27 = vld [vmem:[#allocation2 + $0x78] sm:$0xf0]  ;;  %v1362_v28 = vld [vmem:[#allocation2 + $0x16c] sm:$0xf]  ;;  %v990_v30 = vor.u32 %v1332_v22, %v989_v21 }
  0x30   :  { %529 = vmatpush.bf16.msrb.mxu1 %v1182_v45  ;;  %495 = vmatmul.bf16.vlgmr.msra.gmra.mxu2 %v1578_v51  ;;  %v1119_v29 = vld [vmem:[#allocation2 + $0x178] sm:$0xf0]  ;;  %v1118_v31 = vor.u32 %v1364_v25, %v1117_v23  ;;  %v994_v32 = vor.u32 %v1330_v26, %v991_v27  ;;  %v973_v33 = vld [vmem:[#allocation2 + $0x48] sm:$0xf]  ;;  %v1328_v34 = vld [vmem:[#allocation2 + $0x54] sm:$0xf0] }
  0x31   :  { %543 = vmatpush.bf16.msrb.mxu2 %v1058_v46  ;;  %509 = vmatmul.bf16.vlgmr.msra.gmra.mxu3 %v1580_v55  ;;  %v1101_v35 = vld [vmem:[#allocation2 + $0x148] sm:$0xf]  ;;  %v1122_v36 = vor.u32 %v1362_v28, %v1119_v29  ;;  %v1360_v37 = vld [vmem:[#allocation2 + $0x154] sm:$0xf0]  ;;  %v1326_v38 = vld [vmem:[#allocation2 + $0x4c] sm:$0xf]  ;;  %v974_v42 = vor.u32 %v1328_v34, %v973_v33 }
  0x32   :  { %557 = vmatpush.bf16.msrb.mxu3 %v1186_v50  ;;  %v975_v39 = vld [vmem:[#allocation2 + $0x58] sm:$0xf0]  ;;  %v1358_v40 = vld [vmem:[#allocation2 + $0x14c] sm:$0xf]  ;;  %v1102_v43 = vor.u32 %v1360_v37, %v1101_v35  ;;  %v957_v45 = vld [vmem:[#allocation2 + $0x28] sm:$0xf] }
  0x33   :  { %516 = vmatpush.bf16.msrb.mxu0 %v1038_v58  ;;  %v1103_v41 = vld [vmem:[#allocation2 + $0x158] sm:$0xf0]  ;;  %v978_v44 = vor.u32 %v1326_v38, %v975_v39  ;;  %v1324_v46 = vld [vmem:[#allocation2 + $0x34] sm:$0xf0]  ;;  %v1085_v47 = vld [vmem:[#allocation2 + $0x128] sm:$0xf] }
  0x34   :  { %530 = vmatpush.bf16.msrb.mxu1 %v1166_v59  ;;  %v1106_v48 = vor.u32 %v1358_v40, %v1103_v41  ;;  %v1356_v49 = vld [vmem:[#allocation2 + $0x134] sm:$0xf0]  ;;  %v1322_v50 = vld [vmem:[#allocation2 + $0x2c] sm:$0xf]  ;;  %v959_v52 = vld [vmem:[#allocation2 + $0x38] sm:$0xf0]  ;;  %v958_v56 = vor.u32 %v1324_v46, %v957_v45 }
  0x35   :  { %544 = vmatpush.bf16.msrb.mxu2 %v1042_v60  ;;  %v1354_v53 = vld [vmem:[#allocation2 + $0x12c] sm:$0xf]  ;;  %v1087_v54 = vld [vmem:[#allocation2 + $0x138] sm:$0xf0]  ;;  %v1086_v57 = vor.u32 %v1356_v49, %v1085_v47  ;;  %v962_v58 = vor.u32 %v1322_v50, %v959_v52  ;;  %v941_v59 = vld [vmem:[#allocation2 + $0x8] sm:$0xf] }
  0x36   :  { %558 = vmatpush.bf16.msrb.mxu3 %v1170_v0  ;;  %v1320_v60 = vld [vmem:[#allocation2 + $0x14] sm:$0xf0]  ;;  %v1069_v61 = vld [vmem:[#allocation2 + $0x108] sm:$0xf]  ;;  %v1090_v62 = vor.u32 %v1354_v53, %v1087_v54  ;;  %v1318_v0 = vld [vmem:[#allocation2 + $0xc] sm:$0xf] }
  0x37   :  { %517 = vmatpush.bf16.msrb.mxu0 %v1022_v6  ;;  %v1352_v63 = vld [vmem:[#allocation2 + $0x114] sm:$0xf0]  ;;  %v943_v1 = vld [vmem:[#allocation2 + $0x18] sm:$0xf0]  ;;  %v1350_v2 = vld [vmem:[#allocation2 + $0x10c] sm:$0xf]  ;;  %v942_v4 = vor.u32 %v1320_v60, %v941_v59 }
  0x38   :  { %531 = vmatpush.bf16.msrb.mxu1 %v1150_v7  ;;  %v1071_v3 = vld [vmem:[#allocation2 + $0x118] sm:$0xf0]  ;;  %v1070_v5 = vor.u32 %v1352_v63, %v1069_v61  ;;  %v946_v6 = vor.u32 %v1318_v0, %v943_v1  ;;  %v1387_v10 = vld [vmem:[#allocation5 + $0x30] sm:$0xff]  ;;  %v1386_v11 = vld [vmem:[#allocation5 + $0x28] sm:$0xff]  ;;  %s909_s18 = sshll.u32 %s1610_s5, 4  ;;  %s1528_s19 = smov 128   ;;  %s910_s18 = int_to_ptr.hbm [resolvable:$true] %s909_s18 }
  0x39   :  { %545 = vmatpush.bf16.msrb.mxu2 %v1026_v8  ;;  %v1074_v7 = vor.u32 %v1350_v2, %v1071_v3  ;;  %v1388_v8 = vld [vmem:[#allocation5 + $0x38] sm:$0xff]  ;;  %v1385_v13 = vld [vmem:[#allocation5 + $0x20] sm:$0xff]  ;;  %v1394_v14 = vld [vmem:[#allocation5 + $0x68] sm:$0xff]  ;;  %s1529_s20 = smov 8  }
  0x3a   :  { %559 = vmatpush.bf16.msrb.mxu3 %v1154_v12  ;;  %v1396_v9 = vld [vmem:[#allocation5 + $0x78] sm:$0xff]  ;;  %v1395_v12 = vld [vmem:[#allocation5 + $0x70] sm:$0xff]  ;;  %v1393_v16 = vld [vmem:[#allocation5 + $0x60] sm:$0xff] }
  0x3b   :  { %518 = vmatpush.bf16.msrb.mxu0 %v1006_v18  ;;  %v1384_v15 = vld [vmem:[#allocation5 + $0x18] sm:$0xff]  ;;  %v1383_v17 = vld [vmem:[#allocation5 + $0x10] sm:$0xff]  ;;  %v1390_v21 = vld [vmem:[#allocation5 + $0x48] sm:$0xff] }
  0x3c   :  { %532 = vmatpush.bf16.msrb.mxu1 %v1134_v19  ;;  %v1392_v18 = vld [vmem:[#allocation5 + $0x58] sm:$0xff]  ;;  %v1391_v19 = vld [vmem:[#allocation5 + $0x50] sm:$0xff]  ;;  %v1389_v23 = vld [vmem:[#allocation5 + $0x40] sm:$0xff] }
  0x3d   :  { %546 = vmatpush.bf16.msrb.mxu2 %v1010_v20  ;;  %v1404_v20 = vld [vmem:[#allocation5 + $0xb8] sm:$0xff]  ;;  %v1403_v22 = vld [vmem:[#allocation5 + $0xb0] sm:$0xff]  ;;  %v1402_v25 = vld [vmem:[#allocation5 + $0xa8] sm:$0xff] }
  0x3e   :  { %560 = vmatpush.bf16.msrb.mxu3 %v1138_v24  ;;  %v1412_v24 = vld [vmem:[#allocation5 + $0xf8] sm:$0xff]  ;;  %v1593_v26 = vld [vmem:[%s1607_s2] sm:$0xf]  ;;  %v1411_v27 = vld [vmem:[#allocation5 + $0xf0] sm:$0xff] }
  0x3f   :  { %519 = vmatpush.bf16.msrb.mxu0 %v990_v30  ;;  %v121_v28 = vperm.slane %v1593_v26, 0  ;;  %v1401_v29 = vld [vmem:[#allocation5 + $0xa0] sm:$0xff]  ;;  %v1400_v34 = vld [vmem:[#allocation5 + $0x98] sm:$0xff]  ;;  %v122_v35 = vperm.slane %v1593_v26, 1  ;;  %v1399_v40 = vld [vmem:[#allocation5 + $0x90] sm:$0xff]  ;;  %v123_v1 = vperm.slane %v1593_v26, 2 }
  0x40   :  { %533 = vmatpush.bf16.msrb.mxu1 %v1118_v31  ;;  %v1409_v37 = vld [vmem:[#allocation5 + $0xe0] sm:$0xff]  ;;  %v1408_v45 = vld [vmem:[#allocation5 + $0xd8] sm:$0xff]  ;;  %v1398_v47 = vld [vmem:[#allocation5 + $0x88] sm:$0xff] }
  0x41   :  { %547 = vmatpush.bf16.msrb.mxu2 %v994_v32  ;;  %v1410_v32 = vld [vmem:[#allocation5 + $0xe8] sm:$0xff]  ;;  %v1407_v50 = vld [vmem:[#allocation5 + $0xd0] sm:$0xff]  ;;  %v1397_v54 = vld [vmem:[#allocation5 + $0x80] sm:$0xff] }
  0x42   :  { %561 = vmatpush.bf16.msrb.mxu3 %v1122_v36  ;;  %v1405_v60 = vld [vmem:[#allocation5 + $0xc0] sm:$0xff] }
  0x43   :  { %520 = vmatpush.bf16.msrb.mxu0 %v974_v42 }
  0x44   :  { %534 = vmatpush.bf16.msrb.mxu1 %v1102_v43 }
  0x45   :  { %548 = vmatpush.bf16.msrb.mxu2 %v978_v44 }
  0x46   :  { %562 = vmatpush.bf16.msrb.mxu3 %v1106_v48 }
  0x47   :  { %521 = vmatpush.bf16.msrb.mxu0 %v958_v56 }
  0x48   :  { %535 = vmatpush.bf16.msrb.mxu1 %v1086_v57  ;;  %v1406_v57 = vld [vmem:[#allocation5 + $0xc8] sm:$0xff] }
  0x49   :  { %549 = vmatpush.bf16.msrb.mxu2 %v962_v58 }
  0x4a   :  { %563 = vmatpush.bf16.msrb.mxu3 %v1090_v62 }
  0x4b   :  { %522 = vmatpush.bf16.msrb.mxu0 %v942_v4 }
  0x4c   :  { %536 = vmatpush.bf16.msrb.mxu1 %v1070_v5  ;;  %v124_v5 = vperm.slane %v1593_v26, 3 }
  0x4d   :  { %550 = vmatpush.bf16.msrb.mxu2 %v946_v6 }
  0x4e   :  { %564 = vmatpush.bf16.msrb.mxu3 %v1074_v7  ;;  %523 = vmatmul.bf16.vlgmr.msrb.gmra.mxu0 %v1578_v51 }
  0x4f   :  { %843 = vmatpush.bf16.msra.mxu0 %v1388_v8  ;;  %537 = vmatmul.bf16.vlgmr.msrb.gmra.mxu1 %v1580_v55 }
  0x50   :  { %857 = vmatpush.bf16.msra.mxu1 %v1396_v9  ;;  %551 = vmatmul.bf16.vlgmr.msrb.gmra.mxu2 %v1578_v51  ;;  %v1382_v51 = vld [vmem:[#allocation5 + $0x8] sm:$0xff] }
  0x51   :  { %565 = vmatmul.bf16.vlgmr.msrb.gmra.mxu3 %v1580_v55  ;;  %v1381_v55 = vld [vmem:[#allocation5] sm:$0xff]  ;;  %871 = vmatpush.bf16.msra.mxu2 %v1404_v20 }
  0x52   :  { %885 = vmatpush.bf16.msra.mxu3 %v1412_v24 }
  0x53   :  { %844 = vmatpush.bf16.msra.mxu0 %v1387_v10 }
  0x54   :  { %858 = vmatpush.bf16.msra.mxu1 %v1395_v12 }
  0x55   :  { %872 = vmatpush.bf16.msra.mxu2 %v1403_v22 }
  0x56   :  { %886 = vmatpush.bf16.msra.mxu3 %v1411_v27 }
  0x57   :  { %845 = vmatpush.bf16.msra.mxu0 %v1386_v11 }
  0x58   :  { %859 = vmatpush.bf16.msra.mxu1 %v1394_v14 }
  0x59   :  { %873 = vmatpush.bf16.msra.mxu2 %v1402_v25 }
  0x5a   :  { %887 = vmatpush.bf16.msra.mxu3 %v1410_v32 }
  0x5b   :  { %846 = vmatpush.bf16.msra.mxu0 %v1385_v13 }
  0x5c   :  { %860 = vmatpush.bf16.msra.mxu1 %v1393_v16 }
  0x5d   :  { %874 = vmatpush.bf16.msra.mxu2 %v1401_v29 }
  0x5e   :  { %888 = vmatpush.bf16.msra.mxu3 %v1409_v37 }
  0x5f   :  { %847 = vmatpush.bf16.msra.mxu0 %v1384_v15 }
  0x60   :  { %861 = vmatpush.bf16.msra.mxu1 %v1392_v18 }
  0x61   :  { %875 = vmatpush.bf16.msra.mxu2 %v1400_v34 }
  0x62   :  { %889 = vmatpush.bf16.msra.mxu3 %v1408_v45 }
  0x63   :  { %848 = vmatpush.bf16.msra.mxu0 %v1383_v17 }
  0x64   :  { %862 = vmatpush.bf16.msra.mxu1 %v1391_v19 }
  0x65   :  { %876 = vmatpush.bf16.msra.mxu2 %v1399_v40 }
  0x66   :  { %890 = vmatpush.bf16.msra.mxu3 %v1407_v50 }
  0x67   :  { %849 = vmatpush.bf16.msra.mxu0 %v1382_v51 }
  0x68   :  { %863 = vmatpush.bf16.msra.mxu1 %v1390_v21 }
  0x69   :  { %877 = vmatpush.bf16.msra.mxu2 %v1398_v47 }
  0x6a   :  { %891 = vmatpush.bf16.msra.mxu3 %v1406_v57 }
  0x6b   :  { %850 = vmatpush.bf16.msra.mxu0 %v1381_v55 }
  0x6c   :  { %864 = vmatpush.bf16.msra.mxu1 %v1389_v23  ;;  %v1422_v23 = vld [vmem:[%s1609_s4] ss:$0 sm:$0xff]  ;;  %s1527_s4 = smov [#allocation7]  }
  0x6d   :  { %878 = vmatpush.bf16.msra.mxu2 %v1397_v54  ;;  %s907_s15 = sshll.u32 %s1527_s4, 4  ;;  %s908_s15 = int_to_ptr.vmem [resolvable:$true] %s907_s15 }
  0x6e   :  { %892 = vmatpush.bf16.msra.mxu3 %v1405_v60 }
  0xab   :  { %v468_v30 = vpop.f32.mrf.mxu0 }
  0xac   :  { %v482_v31 = vpop.f32.mrf.mxu1  ;;  %v469_v33 = vadd.f32 %v468_v30, %v121_v28 }
  0xae   :  { %v483_v39 = vadd.f32 %v482_v31, %v469_v33 }
  0xb0   :  { %1423 = vtanh.f32 %v483_v39 }
  0xb3   :  { %v496_v36 = vpop.f32.mrf.mxu2  ;;  %v470_v42 = vpop.f32.mrf.mxu0 }
  0xb4   :  { %v510_v38 = vpop.f32.mrf.mxu3  ;;  %v497_v41 = vadd.f32 %v496_v36, %v122_v35  ;;  %v471_v43 = vadd.f32 %v470_v42, %v121_v28  ;;  %v484_v44 = vpop.f32.mrf.mxu1 }
  0xb6   :  { %v485_v46 = vadd.f32 %v484_v44, %v471_v43  ;;  %v511_v48 = vadd.f32 %v510_v38, %v497_v41  ;;  %v1424_v58 = vpop.eup %1423 }
  0xb8   :  { %1425 = vtanh.f32 %v485_v46 }
  0xb9   :  { %1427 = vtanh.f32 %v511_v48 }
  0xbb   :  { %v498_v49 = vpop.f32.mrf.mxu2 }
  0xbc   :  { %v499_v52 = vadd.f32 %v498_v49, %v122_v35  ;;  %v512_v53 = vpop.f32.mrf.mxu3 }
  0xbe   :  { %v513_v56 = vadd.f32 %v512_v53, %v499_v52  ;;  %v1426_v59 = vpop.eup %1425 }
  0xbf   :  { %v579_v61 = vpack.c.bf16 %v1426_v59, %v1424_v58  ;;  %v1428_v62 = vpop.eup %1427 }
  0xc0   :  { %1429 = vtanh.f32 %v513_v56 }
  0xc1   :  { %851 = vmatmul.bf16.vlgmr.msra.gmra.mxu0 %v579_v61 }
  0xc6   :  { %v1430_v63 = vpop.eup %1429 }
  0xc7   :  { %v580_v0 = vpack.c.bf16 %v1430_v63, %v1428_v62 }
  0xc9   :  { %865 = vmatmul.bf16.vlgmr.msra.gmra.mxu1 %v580_v0 }
  0xcb   :  { %v524_v2 = vpop.f32.mrf.mxu0 }
  0xcc   :  { %v538_v3 = vpop.f32.mrf.mxu1  ;;  %v525_v4 = vadd.f32 %v524_v2, %v123_v1 }
  0xce   :  { %v539_v7 = vadd.f32 %v538_v3, %v525_v4 }
  0xd0   :  { %1431 = vtanh.f32 %v539_v7 }
  0xd3   :  { %v552_v6 = vpop.f32.mrf.mxu2  ;;  %v526_v9 = vpop.f32.mrf.mxu0 }
  0xd4   :  { %v566_v8 = vpop.f32.mrf.mxu3  ;;  %v527_v10 = vadd.f32 %v526_v9, %v123_v1  ;;  %v540_v11 = vpop.f32.mrf.mxu1  ;;  %v553_v12 = vadd.f32 %v552_v6, %v124_v5 }
  0xd6   :  { %v541_v13 = vadd.f32 %v540_v11, %v527_v10  ;;  %v567_v14 = vadd.f32 %v566_v8, %v553_v12  ;;  %v1432_v18 = vpop.eup %1431 }
  0xd8   :  { %1433 = vtanh.f32 %v541_v13 }
  0xd9   :  { %1435 = vtanh.f32 %v567_v14 }
  0xdb   :  { %v554_v15 = vpop.f32.mrf.mxu2 }
  0xdc   :  { %v555_v16 = vadd.f32 %v554_v15, %v124_v5  ;;  %v568_v17 = vpop.f32.mrf.mxu3 }
  0xde   :  { %v569_v51 = vadd.f32 %v568_v17, %v555_v16  ;;  %v1434_v19 = vpop.eup %1433 }
  0xdf   :  { %v581_v55 = vpack.c.bf16 %v1434_v19, %v1432_v18  ;;  %v1436_v20 = vpop.eup %1435 }
  0xe0   :  { %1437 = vtanh.f32 %v569_v51 }
  0xe1   :  { %879 = vmatmul.bf16.vlgmr.msra.gmra.mxu2 %v581_v55 }
  0xe6   :  { %v1438_v21 = vpop.eup %1437 }
  0xe7   :  { %v582_v22 = vpack.c.bf16 %v1438_v21, %v1436_v20 }
  0xe9   :  { %893 = vmatmul.bf16.vlgmr.msra.gmra.mxu3 %v582_v22 }
 0x13e   :  { %v852_v24 = vpop.f32.mrf.mxu0 }
 0x13f   :  { %v853_v26 = vadd.f32 %v1422_v23, %v852_v24 }
 0x146   :  { %v866_v25 = vpop.f32.mrf.mxu1  ;;  %v854_v30 = vpop.f32.mrf.mxu0 }
 0x147   :  { %v867_v28 = vadd.f32 %v866_v25, %v853_v26  ;;  %v855_v34 = vadd.f32 %v1422_v23, %v854_v30 }
 0x14e   :  { %v868_v33 = vpop.f32.mrf.mxu1 }
 0x14f   :  { %v869_v36 = vadd.f32 %v868_v33, %v855_v34 }
 0x164   :  { %v880_v27 = vpop.f32.mrf.mxu2 }
 0x165   :  { %v881_v29 = vadd.f32 %v880_v27, %v867_v28 }
 0x16c   :  { %v894_v31 = vpop.f32.mrf.mxu3  ;;  %v882_v35 = vpop.f32.mrf.mxu2 }
 0x16d   :  { %v895_v32 = vadd.f32 %v894_v31, %v881_v29  ;;  %v883_v37 = vadd.f32 %v882_v35, %v869_v36 }
 0x16f   :  { %1439 = vtanh.f32 %v895_v32 }
 0x174   :  { %v896_v38 = vpop.f32.mrf.mxu3 }
 0x175   :  { %v1440_v39 = vpop.eup %1439  ;;  %v897_v40 = vadd.f32 %v896_v38, %v883_v37 }
 0x176   :  { %901 = vst [vmem:[#allocation7] sm:$0xff] %v1440_v39 }
 0x177   :  { %1441 = vtanh.f32 %v897_v40 }
 0x17d   :  { %v1442_v41 = vpop.eup %1441 }
 0x17e   :  { %902 = vst [vmem:[#allocation7 + $0x8] sm:$0xff] %v1442_v41 }
 0x17f   :  { %915 = dma.vmem_to_hbm [thread:$0]  %s908_s15, 256, %s910_s18, [#allocation4], %s1528_s19, %s1528_s19, %s1529_s20  }
 0x180   :  { %1519 = dma.done.wait [#allocation4], 256  }
 0x181   :  { %1520 = vsyncadd [#allocation4], 4294967040 }
 0x182   :  { %920 = vsyncpa [#allocation3], 1 }
 0x183   :  { %921 = vsyncpa [#allocation6], 1 }
 0x184   :  { %922 = vsyncpa [#allocation4], 1 }

</bundles_post_ra>
